<compile_context>
chip_gen: v7x
topology: tpu7x:2x2x1
jax: 0.10.0
libtpu: 0.0.40
codegen_flags: <defaults>
</compile_context>

<pallas_src>
import jax
import jax.numpy as jnp
from jax.experimental import pallas as pl
from jax.experimental.pallas import tpu as pltpu

_VMEM_LIMIT = 48 * 1024 * 1024  # <= 48 MiB: safe on v7x (64 MiB), fine on v5e/v6e


def _round_up(x, m):
    return ((x + m - 1) // m) * m


def _row_tile(P, K):
    """K-aware row tile.

    * Large-K GEMM (fused layer-2, K~3136): cap at 2048 rows (~25 MiB VMEM with
      double buffering).
    * Small-K GEMMs (layer-1 K=243, deconv K=144): up to 4096 rows.
    * Whenever P > 16, pick a tile < P so the grid has >= 2 steps and
      dimension_semantics=("parallel",) can shard across both v7x TensorCores.
    """
    max_tp = 2048 if K >= 1024 else 4096
    if P <= 16:
        return P  # single full-extent block (legal for any P)
    return min(max_tp, _round_up((P + 1) // 2, 8))


# ---------------------------------------------------------------------------
# Pallas kernels (bf16 matmul inputs, f32 accumulate / bias / PReLU epilogue)
# ---------------------------------------------------------------------------
def _gemm_bias_prelu_kernel(p_ref, w_ref, b_ref, a_ref, o_ref):
    acc = jnp.dot(p_ref[...], w_ref[...], preferred_element_type=jnp.float32)
    acc = acc + b_ref[...]                                # (1, C) broadcast, f32
    acc = jnp.where(acc >= 0.0, acc, a_ref[...] * acc)    # PReLU in f32
    o_ref[...] = acc.astype(o_ref.dtype)


def _gemm_bias_kernel(p_ref, w_ref, b_ref, o_ref):
    acc = jnp.dot(p_ref[...], w_ref[...], preferred_element_type=jnp.float32)
    acc = acc + b_ref[...]
    o_ref[...] = acc.astype(o_ref.dtype)


def _gemm_fused_two_layer_kernel(p_ref, wa_ref, ba_ref, aa_ref,
                                 wb_ref, bb_ref, ab_ref, o_ref):
    # layer A: conv GEMM + bias + PReLU
    acc = jnp.dot(p_ref[...], wa_ref[...], preferred_element_type=jnp.float32)
    acc = acc + ba_ref[...]
    acc = jnp.where(acc >= 0.0, acc, aa_ref[...] * acc)
    # layer B (fused 1x1 conv): second MXU matmul + bias + PReLU, no HBM round trip
    h = acc.astype(jnp.bfloat16)
    acc2 = jnp.dot(h, wb_ref[...], preferred_element_type=jnp.float32)
    acc2 = acc2 + bb_ref[...]
    acc2 = jnp.where(acc2 >= 0.0, acc2, ab_ref[...] * acc2)
    o_ref[...] = acc2.astype(o_ref.dtype)


# ---------------------------------------------------------------------------
# Tiled GEMM wrappers (no K/C padding, full-extent blocks for K and C)
# ---------------------------------------------------------------------------
def _conv_gemm(patches, w_mat, bias, alpha=None, out_dtype=jnp.bfloat16):
    """(P, K) @ (K, C) + bias [+ PReLU]  ->  (P, C) in out_dtype."""
    P, K = patches.shape
    C = w_mat.shape[1]
    TP = _row_tile(P, K)
    grid = (pl.cdiv(P, TP),)

    patches = patches.astype(jnp.bfloat16)          # no-op when already bf16
    w = w_mat.astype(jnp.bfloat16)
    b = bias.reshape(1, C).astype(jnp.float32)

    inputs = [patches, w, b]
    in_specs = [
        pl.BlockSpec((TP, K), lambda i: (i, 0)),     # row-tiled patches (full K)
        pl.BlockSpec((K, C), lambda i: (0, 0)),      # VMEM-resident weights
        pl.BlockSpec((1, C), lambda i: (0, 0)),      # bias
    ]
    if alpha is not None:
        inputs.append(jnp.full((1, C), alpha, jnp.float32))
        in_specs.append(pl.BlockSpec((1, C), lambda i: (0, 0)))
        kernel = _gemm_bias_prelu_kernel
    else:
        kernel = _gemm_bias_kernel

    out_bytes = jnp.dtype(out_dtype).itemsize
    cost = pl.CostEstimate(
        flops=int(2 * P * K * C),
        transcendentals=0,
        bytes_accessed=int(P * K * 2 + K * C * 2 + C * 8 + P * C * out_bytes),
    )

    return pl.pallas_call(
        kernel,
        out_shape=jax.ShapeDtypeStruct((P, C), out_dtype),
        grid_spec=pltpu.PrefetchScalarGridSpec(
            num_scalar_prefetch=0,
            grid=grid,
            in_specs=in_specs,
            out_specs=pl.BlockSpec((TP, C), lambda i: (i, 0)),
        ),
        compiler_params=pltpu.CompilerParams(
            dimension_semantics=("parallel",),
            vmem_limit_bytes=_VMEM_LIMIT,
        ),
        cost_estimate=cost,
    )(*inputs)


def _fused_conv_gemm(patches, w_a, b_a, alpha_a, w_b, b_b, alpha_b):
    """((P,K)@(K,C1)+b1, PReLU) @ (C1,C2)+b2, PReLU -- both matmuls in one kernel."""
    P, K = patches.shape
    C1 = w_a.shape[1]
    C2 = w_b.shape[1]
    TP = _row_tile(P, K)
    grid = (pl.cdiv(P, TP),)

    patches = patches.astype(jnp.bfloat16)
    wa = w_a.astype(jnp.bfloat16)
    ba = b_a.reshape(1, C1).astype(jnp.float32)
    aa = jnp.full((1, C1), alpha_a, jnp.float32)
    wb = w_b.astype(jnp.bfloat16)
    bb = b_b.reshape(1, C2).astype(jnp.float32)
    ab = jnp.full((1, C2), alpha_b, jnp.float32)

    cost = pl.CostEstimate(
        flops=int(2 * P * K * C1 + 2 * P * C1 * C2),
        transcendentals=0,
        bytes_accessed=int(P * K * 2 + K * C1 * 2 + C1 * C2 * 2
                           + (C1 + C2) * 8 + P * C2 * 2),
    )

    return pl.pallas_call(
        _gemm_fused_two_layer_kernel,
        out_shape=jax.ShapeDtypeStruct((P, C2), jnp.bfloat16),
        grid_spec=pltpu.PrefetchScalarGridSpec(
            num_scalar_prefetch=0,
            grid=grid,
            in_specs=[
                pl.BlockSpec((TP, K), lambda i: (i, 0)),    # patches (row-tiled)
                pl.BlockSpec((K, C1), lambda i: (0, 0)),    # layer-2 weights
                pl.BlockSpec((1, C1), lambda i: (0, 0)),    # layer-2 bias
                pl.BlockSpec((1, C1), lambda i: (0, 0)),    # layer-2 PReLU alpha
                pl.BlockSpec((C1, C2), lambda i: (0, 0)),   # fused 1x1 weights
                pl.BlockSpec((1, C2), lambda i: (0, 0)),    # 1x1 bias
                pl.BlockSpec((1, C2), lambda i: (0, 0)),    # 1x1 PReLU alpha
            ],
            out_specs=pl.BlockSpec((TP, C2), lambda i: (i, 0)),
        ),
        compiler_params=pltpu.CompilerParams(
            dimension_semantics=("parallel",),
            vmem_limit_bytes=_VMEM_LIMIT,
        ),
        cost_estimate=cost,
    )(patches, wa, ba, aa, wb, bb, ab)


# ---------------------------------------------------------------------------
# JAX glue: im2col patch extraction (single bf16 materialization)
# ---------------------------------------------------------------------------
def _im2col(x_padded, kh, kw, stride):
    # x_padded: (N, Hp, Wp, C) NHWC bf16, already spatially padded
    N, Hp, Wp, C = x_padded.shape
    Ho = (Hp - kh) // stride + 1
    Wo = (Wp - kw) // stride + 1
    cols = []
    for i in range(kh):
        for j in range(kw):
            cols.append(
                x_padded[:, i: i + stride * (Ho - 1) + 1: stride,
                            j: j + stride * (Wo - 1) + 1: stride, :]
            )
    patches = jnp.stack(cols, axis=3)  # (N, Ho, Wo, kh*kw, C), bf16, written once
    return patches.reshape(N * Ho * Wo, kh * kw * C), Ho, Wo


def _conv2d(x, w, b, alpha, stride, pad):
    # x: (N,H,W,Cin) NHWC ; w: (Cout, Cin, KH, KW) PyTorch Conv2d layout
    Cout, Cin, KH, KW = w.shape
    N = x.shape[0]
    xp = jnp.pad(x.astype(jnp.bfloat16), ((0, 0), (pad, pad), (pad, pad), (0, 0)))
    patches, Ho, Wo = _im2col(xp, KH, KW, stride)
    w_mat = jnp.transpose(w, (2, 3, 1, 0)).reshape(KH * KW * Cin, Cout)
    y = _conv_gemm(patches, w_mat, b, alpha, out_dtype=jnp.bfloat16)
    return y.reshape(N, Ho, Wo, Cout)       # free reshape, no slice


def _conv2d_fused_1x1(x, w2, b2, a2, w3, b3, a3, stride, pad):
    # conv(w2) + PReLU followed by 1x1 conv(w3) + PReLU, both inside one kernel.
    Cout2, Cin2, KH, KW = w2.shape
    Cout3 = w3.shape[0]
    N = x.shape[0]
    xp = jnp.pad(x.astype(jnp.bfloat16), ((0, 0), (pad, pad), (pad, pad), (0, 0)))
    patches, Ho, Wo = _im2col(xp, KH, KW, stride)
    w2_mat = jnp.transpose(w2, (2, 3, 1, 0)).reshape(KH * KW * Cin2, Cout2)
    w3_mat = jnp.transpose(w3, (2, 3, 1, 0)).reshape(Cout2, Cout3)  # 1x1 kernel
    y = _fused_conv_gemm(patches, w2_mat, b2, a2, w3_mat, b3, a3)
    return y.reshape(N, Ho, Wo, Cout3)


def _conv_transpose2d_s2(x, w_t, b_t):
    # ConvTranspose2d(Cin->Cout, k=5, stride=2, padding=2, output_padding=1)
    # via sub-pixel decomposition: one stride-1 3x3 "combined" conv producing the
    # four output parities (even/even, even/odd, odd/even, odd/odd), then a 2x2
    # pixel shuffle. y[2m+ph, 2n+pw] uses kernel taps:
    #   even parity: kh = 4-2j (j = patch row 0..2), odd parity: kh = 5-2j (j=1,2)
    # with x padded by 1 on every side.
    Cin, Cout, KH, KW = w_t.shape  # (16, 3, 5, 5)
    N, H, W, _ = x.shape
    xp = jnp.pad(x.astype(jnp.bfloat16), ((0, 0), (1, 1), (1, 1), (0, 0)))
    patches, Ho, Wo = _im2col(xp, 3, 3, 1)           # Ho == H, Wo == W

    Wc = jnp.zeros((3, 3, Cin, 2, 2, Cout), jnp.float32)
    for j in range(3):
        for l in range(3):
            Wc = Wc.at[j, l, :, 0, 0, :].set(w_t[:, :, 4 - 2 * j, 4 - 2 * l])
            if l >= 1:
                Wc = Wc.at[j, l, :, 0, 1, :].set(w_t[:, :, 4 - 2 * j, 5 - 2 * l])
            if j >= 1:
                Wc = Wc.at[j, l, :, 1, 0, :].set(w_t[:, :, 5 - 2 * j, 4 - 2 * l])
            if j >= 1 and l >= 1:
                Wc = Wc.at[j, l, :, 1, 1, :].set(w_t[:, :, 5 - 2 * j, 5 - 2 * l])
    w_mat = Wc.reshape(3 * 3 * Cin, 4 * Cout)        # (144, 12)
    b_comb = jnp.tile(b_t, 4)                        # same bias for all 4 parities

    # Final layer: f32 output, narrow (12-lane) full-extent block -> no 128-pad
    # write amplification, no slice copy afterwards.
    y = _conv_gemm(patches, w_mat, b_comb, alpha=None, out_dtype=jnp.float32)
    y = y.reshape(N, H, W, 2, 2, Cout)
    y = jnp.transpose(y, (0, 1, 3, 2, 4, 5)).reshape(N, 2 * H, 2 * W, Cout)
    return y


# ---------------------------------------------------------------------------
# Deterministic parameter init (mirrors shapes of FastARCNN.__init__)
# ---------------------------------------------------------------------------
def init_params(key):
    ks = jax.random.split(key, 8)

    def conv_w(k, shape):  # nn.init.normal_(weight, std=0.001)
        return 0.001 * jax.random.normal(k, shape, jnp.float32)

    def bias(k, fan_in, n):  # PyTorch default bias init: U(-1/sqrt(fan_in), +)
        bound = 1.0 / float(fan_in) ** 0.5
        return jax.random.uniform(k, (n,), jnp.float32, -bound, bound)

    return {
        "w1": conv_w(ks[0], (64, 3, 9, 9)),  "b1": bias(ks[1], 3 * 9 * 9, 64),
        "a1": jnp.array(0.25, jnp.float32),
        "w2": conv_w(ks[2], (32, 64, 7, 7)), "b2": bias(ks[3], 64 * 7 * 7, 32),
        "a2": jnp.array(0.25, jnp.float32),
        "w3": conv_w(ks[4], (16, 32, 1, 1)), "b3": bias(ks[5], 32 * 1 * 1, 16),
        "a3": jnp.array(0.25, jnp.float32),
        "wt": conv_w(ks[6], (16, 3, 5, 5)),  "bt": bias(ks[7], 3 * 5 * 5, 3),
    }


# ---------------------------------------------------------------------------
# Forward pass (matches FastARCNN.forward)
# ---------------------------------------------------------------------------
@jax.jit
def fast_arcnn_forward(x_nchw, params):
    x = jnp.transpose(x_nchw, (0, 2, 3, 1))  # NCHW -> NHWC
    # base[0:2]: Conv(3->64, k9, s2, p4) + PReLU               (bf16 intermediate)
    x = _conv2d(x, params["w1"], params["b1"], params["a1"], stride=2, pad=4)
    # base[2:6]: Conv(64->32, k7, s2, p3) + PReLU fused with Conv(32->16, k1) + PReLU
    x = _conv2d_fused_1x1(x, params["w2"], params["b2"], params["a2"],
                          params["w3"], params["b3"], params["a3"], stride=2, pad=3)
    # last: ConvTranspose(16->3, k5, s2, p2, output_padding=1), no activation (f32)
    x = _conv_transpose2d_s2(x, params["wt"], params["bt"])
    return jnp.transpose(x, (0, 3, 1, 2))  # NHWC -> NCHW


if __name__ == "__main__":
    key = jax.random.PRNGKey(0)
    pkey, xkey = jax.random.split(key)
    params = init_params(pkey)
    x = jax.random.normal(xkey, (2, 3, 16, 16), jnp.float32)  # NCHW like PyTorch
    y = fast_arcnn_forward(x, params)
    jax.block_until_ready(y)
    # 16 -> conv s2 -> 8 -> conv s2 -> 4 -> (fused 1x1) -> 4 -> deconv s2 -> 8
    assert y.shape == (2, 3, 8, 8), y.shape
    assert y.dtype == jnp.float32
    assert bool(jnp.all(jnp.isfinite(y)))
    print("KERNEL_OK")
</pallas_src>

<mosaic_0001>
module attributes {stable_mosaic.version = 11 : i64} {
  func.func @_gemm_bias_prelu_kernel(%arg0: i32, %arg1: memref<64x243xbf16, #tpu.memory_space<vmem>>, %arg2: memref<243x64xbf16, #tpu.memory_space<vmem>>, %arg3: memref<1x64xf32, #tpu.memory_space<vmem>>, %arg4: memref<1x64xf32, #tpu.memory_space<vmem>>, %arg5: memref<64x64xbf16, #tpu.memory_space<vmem>>) attributes {dimension_semantics = [#tpu.dimension_semantics<parallel>], iteration_bounds = array<i64: 2>, scalar_prefetch = 0 : i64, scratch_operands = 0 : i64, tpu.core_type = #tpu.core_type<tc>, window_params = [{transform_indices = @transform_0, window_bounds = array<i64: 64, 243>}, {pipeline_mode = #tpu.pipeline_mode<synchronous>, transform_indices = @transform_1, window_bounds = array<i64: 243, 64>}, {pipeline_mode = #tpu.pipeline_mode<synchronous>, transform_indices = @transform_2, window_bounds = array<i64: 1, 64>}, {pipeline_mode = #tpu.pipeline_mode<synchronous>, transform_indices = @transform_3, window_bounds = array<i64: 1, 64>}, {transform_indices = @transform_4, window_bounds = array<i64: 64, 64>}]} {
    %c0 = arith.constant 0 : index
    %c0_0 = arith.constant 0 : index
    %0 = vector.load %arg1[%c0, %c0_0] : memref<64x243xbf16, #tpu.memory_space<vmem>>, vector<64x243xbf16>
    %c0_1 = arith.constant 0 : index
    %c0_2 = arith.constant 0 : index
    %1 = vector.load %arg2[%c0_1, %c0_2] : memref<243x64xbf16, #tpu.memory_space<vmem>>, vector<243x64xbf16>
    %cst = arith.constant dense<0.000000e+00> : vector<64x64xf32>
    %2 = tpu.matmul %0, %1, %cst {dimension_numbers = #tpu.dot_dimension_numbers<[1], [0], [0], [1], [0, 0, 1, 1], [], []>} : vector<64x243xbf16>, vector<243x64xbf16>, vector<64x64xf32> -> vector<64x64xf32>
    %c0_3 = arith.constant 0 : index
    %c0_4 = arith.constant 0 : index
    %3 = vector.load %arg3[%c0_3, %c0_4] : memref<1x64xf32, #tpu.memory_space<vmem>>, vector<1x64xf32>
    %4 = vector.broadcast %3 : vector<1x64xf32> to vector<64x64xf32>
    %5 = arith.addf %2, %4 : vector<64x64xf32>
    %cst_5 = arith.constant 0.000000e+00 : f32
    %6 = vector.broadcast %cst_5 : f32 to vector<64x64xf32>
    %7 = arith.cmpf oge, %5, %6 : vector<64x64xf32>
    %c0_6 = arith.constant 0 : index
    %c0_7 = arith.constant 0 : index
    %8 = vector.load %arg4[%c0_6, %c0_7] : memref<1x64xf32, #tpu.memory_space<vmem>>, vector<1x64xf32>
    %9 = vector.broadcast %8 : vector<1x64xf32> to vector<64x64xf32>
    %10 = arith.mulf %9, %5 : vector<64x64xf32>
    %11 = arith.select %7, %5, %10 : vector<64x64xi1>, vector<64x64xf32>
    %12 = arith.truncf %11 : vector<64x64xf32> to vector<64x64xbf16>
    %c0_8 = arith.constant 0 : index
    %c0_9 = arith.constant 0 : index
    %13 = vector.load %arg5[%c0_8, %c0_9] : memref<64x64xbf16, #tpu.memory_space<vmem>>, vector<64x64xbf16>
    tpu.vector_store %arg5[%c0_8, %c0_9], %12 {strides = array<i32>} : memref<64x64xbf16, #tpu.memory_space<vmem>>, vector<64x64xbf16>,
    return
  }
  func.func @transform_0(%arg0: i32) -> (i32, i32) {
    %c0_i32 = arith.constant 0 : i32
    %c0_i32_0 = arith.constant 0 : i32
    return %arg0, %c0_i32 : i32, i32
  }
  func.func @transform_1(%arg0: i32) -> (i32, i32) {
    %c0_i32 = arith.constant 0 : i32
    %c0_i32_0 = arith.constant 0 : i32
    %c0_i32_1 = arith.constant 0 : i32
    return %c0_i32, %c0_i32_0 : i32, i32
  }
  func.func @transform_2(%arg0: i32) -> (i32, i32) {
    %c0_i32 = arith.constant 0 : i32
    %c0_i32_0 = arith.constant 0 : i32
    %c0_i32_1 = arith.constant 0 : i32
    return %c0_i32, %c0_i32_0 : i32, i32
  }
  func.func @transform_3(%arg0: i32) -> (i32, i32) {
    %c0_i32 = arith.constant 0 : i32
    %c0_i32_0 = arith.constant 0 : i32
    %c0_i32_1 = arith.constant 0 : i32
    return %c0_i32, %c0_i32_0 : i32, i32
  }
  func.func @transform_4(%arg0: i32) -> (i32, i32) {
    %c0_i32 = arith.constant 0 : i32
    %c0_i32_0 = arith.constant 0 : i32
    return %arg0, %c0_i32 : i32, i32
  }
}

module attributes {stable_mosaic.version = 11 : i64} {
  func.func @_gemm_fused_two_layer_kernel(%arg0: i32, %arg1: memref<16x3136xbf16, #tpu.memory_space<vmem>>, %arg2: memref<3136x32xbf16, #tpu.memory_space<vmem>>, %arg3: memref<1x32xf32, #tpu.memory_space<vmem>>, %arg4: memref<1x32xf32, #tpu.memory_space<vmem>>, %arg5: memref<32x16xbf16, #tpu.memory_space<vmem>>, %arg6: memref<1x16xf32, #tpu.memory_space<vmem>>, %arg7: memref<1x16xf32, #tpu.memory_space<vmem>>, %arg8: memref<16x16xbf16, #tpu.memory_space<vmem>>) attributes {dimension_semantics = [#tpu.dimension_semantics<parallel>], iteration_bounds = array<i64: 2>, scalar_prefetch = 0 : i64, scratch_operands = 0 : i64, tpu.core_type = #tpu.core_type<tc>, window_params = [{transform_indices = @transform_0, window_bounds = array<i64: 16, 3136>}, {pipeline_mode = #tpu.pipeline_mode<synchronous>, transform_indices = @transform_1, window_bounds = array<i64: 3136, 32>}, {pipeline_mode = #tpu.pipeline_mode<synchronous>, transform_indices = @transform_2, window_bounds = array<i64: 1, 32>}, {pipeline_mode = #tpu.pipeline_mode<synchronous>, transform_indices = @transform_3, window_bounds = array<i64: 1, 32>}, {pipeline_mode = #tpu.pipeline_mode<synchronous>, transform_indices = @transform_4, window_bounds = array<i64: 32, 16>}, {pipeline_mode = #tpu.pipeline_mode<synchronous>, transform_indices = @transform_5, window_bounds = array<i64: 1, 16>}, {pipeline_mode = #tpu.pipeline_mode<synchronous>, transform_indices = @transform_6, window_bounds = array<i64: 1, 16>}, {transform_indices = @transform_7, window_bounds = array<i64: 16, 16>}]} {
    %c0 = arith.constant 0 : index
    %c0_0 = arith.constant 0 : index
    %0 = vector.load %arg1[%c0, %c0_0] : memref<16x3136xbf16, #tpu.memory_space<vmem>>, vector<16x3136xbf16>
    %c0_1 = arith.constant 0 : index
    %c0_2 = arith.constant 0 : index
    %1 = vector.load %arg2[%c0_1, %c0_2] : memref<3136x32xbf16, #tpu.memory_space<vmem>>, vector<3136x32xbf16>
    %cst = arith.constant dense<0.000000e+00> : vector<16x32xf32>
    %2 = tpu.matmul %0, %1, %cst {dimension_numbers = #tpu.dot_dimension_numbers<[1], [0], [0], [1], [0, 0, 1, 1], [], []>} : vector<16x3136xbf16>, vector<3136x32xbf16>, vector<16x32xf32> -> vector<16x32xf32>
    %c0_3 = arith.constant 0 : index
    %c0_4 = arith.constant 0 : index
    %3 = vector.load %arg3[%c0_3, %c0_4] : memref<1x32xf32, #tpu.memory_space<vmem>>, vector<1x32xf32>
    %4 = vector.broadcast %3 : vector<1x32xf32> to vector<16x32xf32>
    %5 = arith.addf %2, %4 : vector<16x32xf32>
    %cst_5 = arith.constant 0.000000e+00 : f32
    %6 = vector.broadcast %cst_5 : f32 to vector<16x32xf32>
    %7 = arith.cmpf oge, %5, %6 : vector<16x32xf32>
    %c0_6 = arith.constant 0 : index
    %c0_7 = arith.constant 0 : index
    %8 = vector.load %arg4[%c0_6, %c0_7] : memref<1x32xf32, #tpu.memory_space<vmem>>, vector<1x32xf32>
    %9 = vector.broadcast %8 : vector<1x32xf32> to vector<16x32xf32>
    %10 = arith.mulf %9, %5 : vector<16x32xf32>
    %11 = arith.select %7, %5, %10 : vector<16x32xi1>, vector<16x32xf32>
    %12 = arith.truncf %11 : vector<16x32xf32> to vector<16x32xbf16>
    %c0_8 = arith.constant 0 : index
    %c0_9 = arith.constant 0 : index
    %13 = vector.load %arg5[%c0_8, %c0_9] : memref<32x16xbf16, #tpu.memory_space<vmem>>, vector<32x16xbf16>
    %cst_10 = arith.constant dense<0.000000e+00> : vector<16x16xf32>
    %14 = tpu.matmul %12, %13, %cst_10 {dimension_numbers = #tpu.dot_dimension_numbers<[1], [0], [0], [1], [0, 0, 1, 1], [], []>} : vector<16x32xbf16>, vector<32x16xbf16>, vector<16x16xf32> -> vector<16x16xf32>
    %c0_11 = arith.constant 0 : index
    %c0_12 = arith.constant 0 : index
    %15 = vector.load %arg6[%c0_11, %c0_12] : memref<1x16xf32, #tpu.memory_space<vmem>>, vector<1x16xf32>
    %16 = vector.broadcast %15 : vector<1x16xf32> to vector<16x16xf32>
    %17 = arith.addf %14, %16 : vector<16x16xf32>
    %cst_13 = arith.constant 0.000000e+00 : f32
    %18 = vector.broadcast %cst_13 : f32 to vector<16x16xf32>
    %19 = arith.cmpf oge, %17, %18 : vector<16x16xf32>
    %c0_14 = arith.constant 0 : index
    %c0_15 = arith.constant 0 : index
    %20 = vector.load %arg7[%c0_14, %c0_15] : memref<1x16xf32, #tpu.memory_space<vmem>>, vector<1x16xf32>
    %21 = vector.broadcast %20 : vector<1x16xf32> to vector<16x16xf32>
    %22 = arith.mulf %21, %17 : vector<16x16xf32>
    %23 = arith.select %19, %17, %22 : vector<16x16xi1>, vector<16x16xf32>
    %24 = arith.truncf %23 : vector<16x16xf32> to vector<16x16xbf16>
    %c0_16 = arith.constant 0 : index
    %c0_17 = arith.constant 0 : index
    %25 = vector.load %arg8[%c0_16, %c0_17] : memref<16x16xbf16, #tpu.memory_space<vmem>>, vector<16x16xbf16>
    tpu.vector_store %arg8[%c0_16, %c0_17], %24 {strides = array<i32>} : memref<16x16xbf16, #tpu.memory_space<vmem>>, vector<16x16xbf16>,
    return
  }
  func.func @transform_0(%arg0: i32) -> (i32, i32) {
    %c0_i32 = arith.constant 0 : i32
    %c0_i32_0 = arith.constant 0 : i32
    return %arg0, %c0_i32 : i32, i32
  }
  func.func @transform_1(%arg0: i32) -> (i32, i32) {
    %c0_i32 = arith.constant 0 : i32
    %c0_i32_0 = arith.constant 0 : i32
    %c0_i32_1 = arith.constant 0 : i32
    return %c0_i32, %c0_i32_0 : i32, i32
  }
  func.func @transform_2(%arg0: i32) -> (i32, i32) {
    %c0_i32 = arith.constant 0 : i32
    %c0_i32_0 = arith.constant 0 : i32
    %c0_i32_1 = arith.constant 0 : i32
    return %c0_i32, %c0_i32_0 : i32, i32
  }
  func.func @transform_3(%arg0: i32) -> (i32, i32) {
    %c0_i32 = arith.constant 0 : i32
    %c0_i32_0 = arith.constant 0 : i32
    %c0_i32_1 = arith.constant 0 : i32
    return %c0_i32, %c0_i32_0 : i32, i32
  }
  func.func @transform_4(%arg0: i32) -> (i32, i32) {
    %c0_i32 = arith.constant 0 : i32
    %c0_i32_0 = arith.constant 0 : i32
    %c0_i32_1 = arith.constant 0 : i32
    return %c0_i32, %c0_i32_0 : i32, i32
  }
  func.func @transform_5(%arg0: i32) -> (i32, i32) {
    %c0_i32 = arith.constant 0 : i32
    %c0_i32_0 = arith.constant 0 : i32
    %c0_i32_1 = arith.constant 0 : i32
    return %c0_i32, %c0_i32_0 : i32, i32
  }
  func.func @transform_6(%arg0: i32) -> (i32, i32) {
    %c0_i32 = arith.constant 0 : i32
    %c0_i32_0 = arith.constant 0 : i32
    %c0_i32_1 = arith.constant 0 : i32
    return %c0_i32, %c0_i32_0 : i32, i32
  }
  func.func @transform_7(%arg0: i32) -> (i32, i32) {
    %c0_i32 = arith.constant 0 : i32
    %c0_i32_0 = arith.constant 0 : i32
    return %arg0, %c0_i32 : i32, i32
  }
}

module attributes {stable_mosaic.version = 11 : i64} {
  func.func @_gemm_bias_kernel(%arg0: i32, %arg1: memref<16x144xbf16, #tpu.memory_space<vmem>>, %arg2: memref<144x12xbf16, #tpu.memory_space<vmem>>, %arg3: memref<1x12xf32, #tpu.memory_space<vmem>>, %arg4: memref<16x12xf32, #tpu.memory_space<vmem>>) attributes {dimension_semantics = [#tpu.dimension_semantics<parallel>], iteration_bounds = array<i64: 2>, scalar_prefetch = 0 : i64, scratch_operands = 0 : i64, tpu.core_type = #tpu.core_type<tc>, window_params = [{transform_indices = @transform_0, window_bounds = array<i64: 16, 144>}, {pipeline_mode = #tpu.pipeline_mode<synchronous>, transform_indices = @transform_1, window_bounds = array<i64: 144, 12>}, {pipeline_mode = #tpu.pipeline_mode<synchronous>, transform_indices = @transform_2, window_bounds = array<i64: 1, 12>}, {transform_indices = @transform_3, window_bounds = array<i64: 16, 12>}]} {
    %c0 = arith.constant 0 : index
    %c0_0 = arith.constant 0 : index
    %0 = vector.load %arg1[%c0, %c0_0] : memref<16x144xbf16, #tpu.memory_space<vmem>>, vector<16x144xbf16>
    %c0_1 = arith.constant 0 : index
    %c0_2 = arith.constant 0 : index
    %1 = vector.load %arg2[%c0_1, %c0_2] : memref<144x12xbf16, #tpu.memory_space<vmem>>, vector<144x12xbf16>
    %cst = arith.constant dense<0.000000e+00> : vector<16x12xf32>
    %2 = tpu.matmul %0, %1, %cst {dimension_numbers = #tpu.dot_dimension_numbers<[1], [0], [0], [1], [0, 0, 1, 1], [], []>} : vector<16x144xbf16>, vector<144x12xbf16>, vector<16x12xf32> -> vector<16x12xf32>
    %c0_3 = arith.constant 0 : index
    %c0_4 = arith.constant 0 : index
    %3 = vector.load %arg3[%c0_3, %c0_4] : memref<1x12xf32, #tpu.memory_space<vmem>>, vector<1x12xf32>
    %4 = vector.broadcast %3 : vector<1x12xf32> to vector<16x12xf32>
    %5 = arith.addf %2, %4 : vector<16x12xf32>
    %c0_5 = arith.constant 0 : index
    %c0_6 = arith.constant 0 : index
    %6 = vector.load %arg4[%c0_5, %c0_6] : memref<16x12xf32, #tpu.memory_space<vmem>>, vector<16x12xf32>
    tpu.vector_store %arg4[%c0_5, %c0_6], %5 {strides = array<i32>} : memref<16x12xf32, #tpu.memory_space<vmem>>, vector<16x12xf32>,
    return
  }
  func.func @transform_0(%arg0: i32) -> (i32, i32) {
    %c0_i32 = arith.constant 0 : i32
    %c0_i32_0 = arith.constant 0 : i32
    return %arg0, %c0_i32 : i32, i32
  }
  func.func @transform_1(%arg0: i32) -> (i32, i32) {
    %c0_i32 = arith.constant 0 : i32
    %c0_i32_0 = arith.constant 0 : i32
    %c0_i32_1 = arith.constant 0 : i32
    return %c0_i32, %c0_i32_0 : i32, i32
  }
  func.func @transform_2(%arg0: i32) -> (i32, i32) {
    %c0_i32 = arith.constant 0 : i32
    %c0_i32_0 = arith.constant 0 : i32
    %c0_i32_1 = arith.constant 0 : i32
    return %c0_i32, %c0_i32_0 : i32, i32
  }
  func.func @transform_3(%arg0: i32) -> (i32, i32) {
    %c0_i32 = arith.constant 0 : i32
    %c0_i32_0 = arith.constant 0 : i32
    return %arg0, %c0_i32 : i32, i32
  }
}

</mosaic_0001>

<bundles_post_ra>
// kernel: fast_arcnn_forward.3
= control target key start
LH: loop header
LB: loop body
LE: loop exit
PB: predicated region body
PF: predicated region fallthrough
CT: control target
= control target key end

     0   :  { %s779_s15 = smov 0   ;;  %s886_s0 = inlined_call_operand.vmem [shape: bf16[128,243], index: 0, kind: input, shape index: {}]   ;;  %s887_s1 = inlined_call_operand.vmem [shape: bf16[243,64], index: 1, kind: input, shape index: {}]   ;;  %s888_s2 = inlined_call_operand.vmem [shape: f32[1,64], index: 2, kind: input, shape index: {}]   ;;  %s889_s3 = inlined_call_operand.vmem [shape: f32[1,64], index: 3, kind: input, shape index: {}]   ;;  %s890_s4 = inlined_call_operand.vmem [shape: bf16[128,64], index: 4, kind: output, shape index: {}]  }
   0x1 LB: > { %s593_s16 = sadd.s32 4294967295, %s751_s15   ;;  %p597_p0 = scmp.ge.s32.totalorder %s751_s15, 1  ;;  %s751_s15 = sphi %s779_s15, %s14_s15  }
   0x2   : > { %p164_p1 = scmp.lt.s32.totalorder %s751_s15, 3 }
   0x4   : > { %p165_p2 = pnand %p597_p0, %p164_p1 }
   0x5   : > { %v717_v0 = vld [vmem:[%s887_s1 + $0x40] sm:$0xff] (!%p165_p2)   ;;  %v719_v2 = vld [vmem:[%s887_s1 + $0x48] sm:$0xff] (!%p165_p2)   ;;  %v721_v4 = vld [vmem:[%s887_s1 + $0x50] sm:$0xff] (!%p165_p2)   ;;  %s598_s27 = sshll.u32 (!%p165_p2), %s593_s16, 3  ;;  %vm393_vm0 = vcmask (!%p165_p2), 1040384   ;;  %vm380_vm1 = vcmask (!%p165_p2), 941056  }
   0x6   : > { %168 = sbr.rel (%p165_p2) target bundleno = 273 (0x111), region = 36  ;;  %v718_v1 = vld [vmem:[%s887_s1] sm:$0xff] (!%p165_p2)   ;;  %652 = vmatprep.subr.bf16.mxu0 (!%p165_p2), %v717_v0  ;;  %692 = vmatprep.subr.bf16.mxu1 (!%p165_p2), %v717_v0  ;;  %v720_v3 = vld [vmem:[%s887_s1 + $0x8] sm:$0xff] (!%p165_p2)   ;;  %p192_p3 = scmp.lt.s32.totalorder (!%p165_p2), %s598_s27, 15  ;;  %v722_v5 = vld [vmem:[%s887_s1 + $0x10] sm:$0xff] (!%p165_p2)   ;;  %vm394_vm2 = vcmask (!%p165_p2), 1041408  }
   0x7   : > { %653 = vmatpush3.bf16.msra.mxu0 (!%p165_p2), %v718_v1  ;;  %700 = vmatpush3.bf16.msra.mxu1 (!%p165_p2), %v718_v1  ;;  %v723_v6 = vld [vmem:[%s887_s1 + $0x58] sm:$0xff] (!%p165_p2)   ;;  %v725_v8 = vld [vmem:[%s887_s1 + $0x60] sm:$0xff] (!%p165_p2)   ;;  %v727_v10 = vld [vmem:[%s887_s1 + $0x68] sm:$0xff] (!%p165_p2)   ;;  %v753_v12 = vmov (!%p165_p2), 65535   ;;  %vm528_vm5 = vcmask (!%p165_p2), 519168  }
   0x8   : > { %654 = vmatprep.subr.bf16.mxu0 (!%p165_p2), %v719_v2  ;;  %693 = vmatprep.subr.bf16.mxu1 (!%p165_p2), %v719_v2  ;;  %v724_v7 = vld [vmem:[%s887_s1 + $0x18] sm:$0xff] (!%p165_p2)   ;;  %v726_v9 = vld [vmem:[%s887_s1 + $0x20] sm:$0xff] (!%p165_p2)   ;;  %v395_v13 = vsel (!%p165_p2), %vm393_vm0, 4294967295, %v753_v12  ;;  %v728_v15 = vld [vmem:[%s887_s1 + $0x28] sm:$0xff] (!%p165_p2)  }
   0x9   : > { %v729_v16 = vld [vmem:[%s887_s1 + $0x70] sm:$0xff] (!%p165_p2)   ;;  %v731_v17 = vld [vmem:[%s887_s1 + $0x78] ss:$0 sps:$4 sm:$0x33] (!%p165_p2)   ;;  %v396_v18 = vsel (!%p165_p2), %vm394_vm2, %v395_v13, 0 }
   0xa   : > { %v730_v19 = vld [vmem:[%s887_s1 + $0x30] sm:$0xff] (!%p165_p2)   ;;  %v398_v20 = vand.u32 (!%p165_p2), %v731_v17, %v396_v18  ;;  %v732_v21 = vld [vmem:[%s887_s1 + $0x38] sm:$0xff] (!%p165_p2)   ;;  %v603_v30 = vld [vmem:[%s888_s2] ss:$0 sm:$0xff] (!%p165_p2) }
   0xb   : > { %655 = vmatpush3.bf16.msra.mxu0 (!%p165_p2), %v720_v3  ;;  %701 = vmatpush3.bf16.msra.mxu1 (!%p165_p2), %v720_v3  ;;  %v632_v37 = vld [vmem:[%s889_s3] ss:$0 sm:$0xff] (!%p165_p2) }
   0xc   : > { %656 = vmatprep.subr.bf16.mxu0 (!%p165_p2), %v721_v4  ;;  %694 = vmatprep.subr.bf16.mxu1 (!%p165_p2), %v721_v4 }
   0xd   : > { %s892_s27 = smov (!%p192_p3, %s598_s27), 15 }
   0xe   : > { %s643_s6 = sshll.u32 %s892_s27, 3  ;;  %s602_s8 = sshll.u32 %s892_s27, 2 }
   0xf   : > { %657 = vmatpush3.bf16.msra.mxu0 %v722_v5  ;;  %702 = vmatpush3.bf16.msra.mxu1 %v722_v5  ;;  %s820_s13 = scalar_lea.vmem %s886_s0, %s643_s6  ;;  %s865_s11 = scalar_lea.vmem %s890_s4, %s602_s8 }
  0x10   : > { %658 = vmatprep.subr.bf16.mxu0 %v723_v6  ;;  %695 = vmatprep.subr.bf16.mxu1 %v723_v6  ;;  %v735_v11 = vld [vmem:[%s820_s13 + $0x4] ss:$8 sps:$4 sm:$0xff]   ;;  %v733_v22 = vld [vmem:[%s820_s13] ss:$8 sps:$4 sm:$0xff]   ;;  %v739_v24 = vld [vmem:[%s820_s13 + $0x14] ss:$8 sps:$4 sm:$0xff]  }
  0x11   : > { %628 = vmatprep.mubr.msk.bf16.mxu0 %vm380_vm1, %v735_v11  ;;  %v738_v14 = vld [vmem:[%s820_s13 + $0x24] ss:$8 sps:$4 sm:$0xff]   ;;  %v736_v23 = vld [vmem:[%s820_s13 + $0x20] ss:$8 sps:$4 sm:$0xff]   ;;  %v741_v25 = vld [vmem:[%s820_s13 + $0x34] ss:$8 sps:$4 sm:$0xff]  }
  0x12   : > { %630 = vmatprep.mubr.msk.bf16.mxu1 %vm380_vm1, %v738_v14  ;;  %v743_v26 = vld [vmem:[%s820_s13 + $0x10] ss:$8 sps:$4 sm:$0xff]  }
  0x13   : > { %659 = vmatpush3.bf16.msra.mxu0 %v724_v7  ;;  %703 = vmatpush3.bf16.msra.mxu1 %v724_v7  ;;  %v744_v27 = vld [vmem:[%s820_s13 + $0x30] ss:$8 sps:$4 sm:$0xff]  }
  0x14   : > { %660 = vmatprep.subr.bf16.mxu0 %v725_v8  ;;  %696 = vmatprep.subr.bf16.mxu1 %v725_v8 }
  0x17   : > { %661 = vmatpush3.bf16.msra.mxu0 %v726_v9  ;;  %704 = vmatpush3.bf16.msra.mxu1 %v726_v9 }
  0x18   : > { %662 = vmatprep.subr.bf16.mxu0 %v727_v10  ;;  %697 = vmatprep.subr.bf16.mxu1 %v727_v10 }
  0x1b   : > { %663 = vmatpush3.bf16.msra.mxu0 %v728_v15  ;;  %705 = vmatpush3.bf16.msra.mxu1 %v728_v15 }
  0x1c   : > { %664 = vmatprep.subr.bf16.mxu0 %v729_v16  ;;  %698 = vmatprep.subr.bf16.mxu1 %v729_v16 }
  0x1f   : > { %665 = vmatpush3.bf16.msra.mxu0 %v730_v19  ;;  %706 = vmatpush3.bf16.msra.mxu1 %v730_v19 }
  0x20   : > { %666 = vmatprep.subr.bf16.mxu0 %v398_v20  ;;  %699 = vmatprep.subr.bf16.mxu1 %v398_v20 }
  0x23   : > { %667 = vmatpush3.bf16.msra.mxu0 %v732_v21  ;;  %707 = vmatpush3.bf16.msra.mxu1 %v732_v21 }
  0x26   : > { %433 = vmatmul.mubr.bf16.vlgmr.msra.gmra.mrb[0].mxu0 %v733_v22  ;;  %449 = vmatmul.mubr.bf16.vlgmr.msra.gmra.mrb[0].mxu1 %v736_v23 }
  0x27   : > { %629 = vmatprep.mubr.msk.bf16.mxu0 %vm380_vm1, %v739_v24  ;;  %631 = vmatprep.mubr.msk.bf16.mxu1 %vm380_vm1, %v741_v25 }
  0x2e   : > { %441 = vmatmul.mubr.bf16.gmra.mrb[4].mxu0 %v743_v26  ;;  %457 = vmatmul.mubr.bf16.gmra.mrb[4].mxu1 %v744_v27 }
  0xf9   : > { %v668_v28 = vpop.f32.mrb[0].mxu0  ;;  %v680_v29 = vpop.f32.mrb[0].mxu1 }
  0xfa   : > { %v669_v31 = vpop.f32.mrb[1].mxu0  ;;  %v681_v32 = vpop.f32.mrb[1].mxu1 }
  0xfb   : > { %v670_v33 = vadd.f32 %v669_v31, %v668_v28  ;;  %v682_v34 = vadd.f32 %v681_v32, %v680_v29  ;;  %v671_v35 = vpop.f32.mrb[2].mxu0  ;;  %v683_v36 = vpop.f32.mrb[2].mxu1 }
  0xfc   : > { %v672_v38 = vpop.f32.mrb[3].mxu0  ;;  %v684_v39 = vpop.f32.mrb[3].mxu1 }
  0xfd   : > { %v435_v40 = vadd.f32 %v670_v33, %v603_v30  ;;  %v451_v41 = vadd.f32 %v682_v34, %v603_v30  ;;  %v673_v42 = vadd.f32 %v672_v38, %v671_v35  ;;  %v685_v43 = vadd.f32 %v684_v39, %v683_v36 }
  0xff   : > { %vm465_vm3 = vcmp.ge.f32.partialorder %v435_v40, 0.0  ;;  %v480_v44 = vmul.f32 %v632_v37, %v435_v40  ;;  %vm469_vm4 = vcmp.ge.f32.partialorder %v451_v41, 0.0  ;;  %v484_v45 = vmul.f32 %v632_v37, %v451_v41 }
 0x100   : > { %v438_v46 = vadd.f32 %v673_v42, %v603_v30  ;;  %v454_v47 = vadd.f32 %v685_v43, %v603_v30 }
 0x101   : > { %v488_v48 = vsel %vm465_vm3, %v435_v40, %v480_v44  ;;  %v492_v49 = vsel %vm469_vm4, %v451_v41, %v484_v45  ;;  %v674_v50 = vpop.f32.mrb[4].mxu0  ;;  %v686_v51 = vpop.f32.mrb[4].mxu1 }
 0x102   : > { %v644_v52 = vpack.c.bf16 %v488_v48, %v488_v48  ;;  %v648_v53 = vpack.c.bf16 %v492_v49, %v492_v49  ;;  %vm466_vm6 = vcmp.ge.f32.partialorder %v438_v46, 0.0  ;;  %v481_v54 = vmul.f32 %v632_v37, %v438_v46  ;;  %v675_v55 = vpop.f32.mrb[5].mxu0  ;;  %v687_v56 = vpop.f32.mrb[5].mxu1 }
 0x103   : > { %vm470_vm7 = vcmp.ge.f32.partialorder %v454_v47, 0.0  ;;  %v485_v57 = vmul.f32 %v632_v37, %v454_v47  ;;  %v676_v58 = vadd.f32 %v675_v55, %v674_v50  ;;  %v688_v59 = vadd.f32 %v687_v56, %v686_v51  ;;  %v677_v60 = vpop.f32.mrb[6].mxu0  ;;  %v689_v61 = vpop.f32.mrb[6].mxu1 }
 0x104   : > { %529 = vst.msk [vmem:[%s865_s11] sm:$0xf] %vm528_vm5, %v644_v52  ;;  %533 = vst.msk [vmem:[%s865_s11 + $0x10] sm:$0xf] %vm528_vm5, %v648_v53  ;;  %v489_v62 = vsel %vm466_vm6, %v438_v46, %v481_v54  ;;  %v678_v63 = vpop.f32.mrb[7].mxu0  ;;  %v690_v0 = vpop.f32.mrb[7].mxu1 }
 0x105   : > { %v645_v1 = vpack.c.bf16 %v489_v62, %v489_v62  ;;  %v493_v2 = vsel %vm470_vm7, %v454_v47, %v485_v57  ;;  %v443_v3 = vadd.f32 %v676_v58, %v603_v30  ;;  %v459_v4 = vadd.f32 %v688_v59, %v603_v30 }
 0x106   : > { %v649_v5 = vpack.c.bf16 %v493_v2, %v493_v2  ;;  %v679_v6 = vadd.f32 %v678_v63, %v677_v60  ;;  %v691_v7 = vadd.f32 %v690_v0, %v689_v61 }
 0x107   : > { %530 = vst.msk [vmem:[%s865_s11 + $0x4] sm:$0xf] %vm528_vm5, %v645_v1  ;;  %vm467_vm8 = vcmp.ge.f32.partialorder %v443_v3, 0.0  ;;  %v482_v8 = vmul.f32 %v632_v37, %v443_v3  ;;  %vm471_vm9 = vcmp.ge.f32.partialorder %v459_v4, 0.0  ;;  %v486_v9 = vmul.f32 %v632_v37, %v459_v4 }
 0x108   : > { %534 = vst.msk [vmem:[%s865_s11 + $0x14] sm:$0xf] %vm528_vm5, %v649_v5  ;;  %v446_v10 = vadd.f32 %v679_v6, %v603_v30  ;;  %v462_v11 = vadd.f32 %v691_v7, %v603_v30 }
 0x109   : > { %v490_v12 = vsel %vm467_vm8, %v443_v3, %v482_v8  ;;  %v494_v13 = vsel %vm471_vm9, %v459_v4, %v486_v9 }
 0x10a   : > { %v646_v14 = vpack.c.bf16 %v490_v12, %v490_v12  ;;  %v650_v15 = vpack.c.bf16 %v494_v13, %v494_v13  ;;  %vm468_vm10 = vcmp.ge.f32.partialorder %v446_v10, 0.0  ;;  %v483_v16 = vmul.f32 %v632_v37, %v446_v10 }
 0x10b   : > { %vm472_vm11 = vcmp.ge.f32.partialorder %v462_v11, 0.0  ;;  %v487_v17 = vmul.f32 %v632_v37, %v462_v11 }
 0x10c   : > { %531 = vst.msk [vmem:[%s865_s11 + $0x8] sm:$0xf] %vm528_vm5, %v646_v14  ;;  %535 = vst.msk [vmem:[%s865_s11 + $0x18] sm:$0xf] %vm528_vm5, %v650_v15  ;;  %v491_v18 = vsel %vm468_vm10, %v446_v10, %v483_v16 }
 0x10d   : > { %v647_v19 = vpack.c.bf16 %v491_v18, %v491_v18  ;;  %v495_v20 = vsel %vm472_vm11, %v462_v11, %v487_v17 }
 0x10e   : > { %v651_v21 = vpack.c.bf16 %v495_v20, %v495_v20 }
 0x10f   : > { %532 = vst.msk [vmem:[%s865_s11 + $0xc] sm:$0xf] %vm528_vm5, %v647_v19 }
 0x110   : > { %536 = vst.msk [vmem:[%s865_s11 + $0x1c] sm:$0xf] %vm528_vm5, %v651_v21 }
 0x111 PF: > { %s14_s15 = sadd.s32 1, %s751_s15  }
 0x112   : > { %p11_p4 = scmp.ge.s32.totalorder %s14_s15, 4  }
 0x114   :  { %13 = sbr.rel (!%p11_p4) target bundleno = 1 (0x1), region = 66 }

// kernel: fast_arcnn_forward.4
= control target key start
LH: loop header
LB: loop body
LE: loop exit
PB: predicated region body
PF: predicated region fallthrough
CT: control target
= control target key end

     0   :  { %s3543_s24 = smov 0   ;;  %s4199_s0 = inlined_call_operand.vmem [shape: bf16[32,3136], index: 0, kind: input, shape index: {}]   ;;  %s4200_s1 = inlined_call_operand.vmem [shape: bf16[3136,32], index: 1, kind: input, shape index: {}]   ;;  %s4201_s2 = inlined_call_operand.vmem [shape: f32[1,32], index: 2, kind: input, shape index: {}]   ;;  %s4202_s3 = inlined_call_operand.vmem [shape: f32[1,32], index: 3, kind: input, shape index: {}]   ;;  %s4203_s4 = inlined_call_operand.vmem [shape: bf16[32,16], index: 4, kind: input, shape index: {}]   ;;  %s4204_s5 = inlined_call_operand.vmem [shape: f32[1,16], index: 5, kind: input, shape index: {}]   ;;  %s4205_s6 = inlined_call_operand.vmem [shape: f32[1,16], index: 6, kind: input, shape index: {}]   ;;  %s4206_s7 = inlined_call_operand.vmem [shape: bf16[32,16], index: 7, kind: output, shape index: {}]  }
   0x1 LB: > { %s2711_s25 = sadd.s32 4294967295, %s3499_s24   ;;  %p2715_p0 = scmp.ge.s32.totalorder %s3499_s24, 1  ;;  %s3499_s24 = sphi %s3543_s24, %s17_s24  }
   0x2   : > { %p239_p1 = scmp.lt.s32.totalorder %s3499_s24, 3 }
   0x4   : > { %p240_p2 = pnand %p2715_p0, %p239_p1 }
   0x5   : > { %v3258_v0 = vld [vmem:[%s4200_s1 + $0x40] sm:$0xff] (!%p240_p2)   ;;  %v3262_v4 = vld [vmem:[%s4200_s1 + $0x48] sm:$0xff] (!%p240_p2)   ;;  %v3266_v8 = vld [vmem:[%s4200_s1 + $0x50] sm:$0xff] (!%p240_p2)   ;;  %s2716_s10 = sshll.u32 (!%p240_p2), %s2711_s25, 1  ;;  %vm3502_vm0 = vmmov (!%p240_p2), 0   ;;  %vm2012_vm1 = vcmask (!%p240_p2), 523264  }
   0x6   : > { %243 = sbr.rel (%p240_p2) target bundleno = 657 (0x291), region = 48  ;;  %v3259_v1 = vld [vmem:[%s4200_s1] sm:$0xff] (!%p240_p2)   ;;  %2955 = vmatprep.subr.bf16.mxu0 (!%p240_p2), %v3258_v0  ;;  %v3263_v5 = vld [vmem:[%s4200_s1 + $0x8] sm:$0xff] (!%p240_p2)   ;;  %v3267_v9 = vld [vmem:[%s4200_s1 + $0x10] sm:$0xff] (!%p240_p2)   ;;  %p273_p3 = scmp.lt.s32.totalorder (!%p240_p2), %s2716_s10, 3  ;;  %vm2586_vm4 = vcmask (!%p240_p2), 261120  }
   0x7   : > { %v3260_v2 = vld [vmem:[%s4200_s1 + $0xc0] sm:$0xff] (!%p240_p2)   ;;  %2956 = vmatpush3.bf16.msra.mxu0 (!%p240_p2), %v3259_v1  ;;  %v3264_v6 = vld [vmem:[%s4200_s1 + $0xc8] sm:$0xff] (!%p240_p2)   ;;  %v3268_v10 = vld [vmem:[%s4200_s1 + $0xd0] sm:$0xff] (!%p240_p2)   ;;  %vm2652_vm6 = vcmask (!%p240_p2), 125952  }
   0x8   : > { %v3261_v3 = vld [vmem:[%s4200_s1 + $0x80] sm:$0xff] (!%p240_p2)   ;;  %2977 = vmatprep.subr.bf16.mxu1 (!%p240_p2), %v3260_v2  ;;  %2957 = vmatprep.subr.bf16.mxu0 (!%p240_p2), %v3262_v4  ;;  %v3265_v7 = vld [vmem:[%s4200_s1 + $0x88] sm:$0xff] (!%p240_p2)   ;;  %v3269_v11 = vld [vmem:[%s4200_s1 + $0x90] sm:$0xff] (!%p240_p2)  }
   0x9   : > { %2978 = vmatpush3.bf16.msra.mxu1 (!%p240_p2), %v3261_v3  ;;  %v3270_v12 = vld [vmem:[%s4200_s1 + $0x58] sm:$0xff] (!%p240_p2)   ;;  %v3274_v16 = vld [vmem:[%s4200_s1 + $0x60] sm:$0xff] (!%p240_p2)   ;;  %v3278_v20 = vld [vmem:[%s4200_s1 + $0x68] sm:$0xff] (!%p240_p2)  }
   0xa   : > { %2979 = vmatprep.subr.bf16.mxu1 (!%p240_p2), %v3264_v6  ;;  %v3271_v13 = vld [vmem:[%s4200_s1 + $0x18] sm:$0xff] (!%p240_p2)   ;;  %v3275_v17 = vld [vmem:[%s4200_s1 + $0x20] sm:$0xff] (!%p240_p2)   ;;  %v3279_v21 = vld [vmem:[%s4200_s1 + $0x28] sm:$0xff] (!%p240_p2)  }
   0xb   : > { %2958 = vmatpush3.bf16.msra.mxu0 (!%p240_p2), %v3263_v5  ;;  %v3272_v14 = vld [vmem:[%s4200_s1 + $0xd8] sm:$0xff] (!%p240_p2)   ;;  %v3276_v18 = vld [vmem:[%s4200_s1 + $0xe0] sm:$0xff] (!%p240_p2)   ;;  %v3280_v22 = vld [vmem:[%s4200_s1 + $0xe8] sm:$0xff] (!%p240_p2)  }
   0xc   : > { %2959 = vmatprep.subr.bf16.mxu0 (!%p240_p2), %v3266_v8  ;;  %v3273_v15 = vld [vmem:[%s4200_s1 + $0x98] sm:$0xff] (!%p240_p2)   ;;  %v3277_v19 = vld [vmem:[%s4200_s1 + $0xa0] sm:$0xff] (!%p240_p2)   ;;  %v3281_v23 = vld [vmem:[%s4200_s1 + $0xa8] sm:$0xff] (!%p240_p2)  }
   0xd   : > { %2980 = vmatpush3.bf16.msra.mxu1 %v3265_v7  ;;  %s4208_s10 = smov (!%p273_p3, %s2716_s10), 3  ;;  %v3282_v24 = vld [vmem:[%s4200_s1 + $0x70] sm:$0xff]   ;;  %v3286_v28 = vld [vmem:[%s4200_s1 + $0x78] sm:$0xff]   ;;  %v3293_v34 = vld [vmem:[%s4200_s1 + $0x140] sm:$0xff]  }
   0xe   : > { %2981 = vmatprep.subr.bf16.mxu1 %v3268_v10  ;;  %s3247_s12 = smul.u32 100, %s4208_s10  ;;  %v3283_v25 = vld [vmem:[%s4200_s1 + $0x30] sm:$0xff]   ;;  %v3287_v29 = vld [vmem:[%s4200_s1 + $0x38] sm:$0xff]   ;;  %v3297_v37 = vld [vmem:[%s4200_s1 + $0x100] sm:$0xff]   ;;  %s2719_s30 = sshll.u32 %s4208_s10, 2 }
   0xf   : > { %2960 = vmatpush3.bf16.msra.mxu0 %v3267_v9  ;;  %v3284_v26 = vld [vmem:[%s4200_s1 + $0xf0] sm:$0xff]   ;;  %v3288_v30 = vld [vmem:[%s4200_s1 + $0xf8] sm:$0xff]   ;;  %v3298_v38 = vld [vmem:[%s4200_s1 + $0x1c0] sm:$0xff]   ;;  %s283_s11 = scalar_lea.vmem %s4206_s7, %s2719_s30 }
  0x10   : > { %2961 = vmatprep.subr.bf16.mxu0 %v3270_v12  ;;  %v3285_v27 = vld [vmem:[%s4200_s1 + $0xb0] sm:$0xff]   ;;  %s3646_s22 = scalar_lea.vmem %s4199_s0, %s3247_s12  ;;  %v3292_v33 = vld [vmem:[%s4200_s1 + $0xb8] sm:$0xff]   ;;  %v3299_v39 = vld [vmem:[%s4200_s1 + $0x180] sm:$0xff]  }
  0x11   : > { %2982 = vmatpush3.bf16.msra.mxu1 %v3269_v11  ;;  %v3289_v31 = vld [vmem:[%s3646_s22] ss:$100 sps:$4 sm:$0xff]   ;;  %v3294_v35 = vld [vmem:[%s3646_s22 + $0x8] ss:$100 sps:$4 sm:$0xff]   ;;  %v3304_v44 = vld [vmem:[%s4200_s1 + $0x150] sm:$0xff]  }
  0x12   : > { %2983 = vmatprep.subr.bf16.mxu1 %v3272_v14  ;;  %v3291_v32 = vld [vmem:[%s3646_s22 + $0x4] ss:$100 sps:$4 sm:$0xff]   ;;  %v3296_v36 = vld [vmem:[%s3646_s22 + $0xc] ss:$100 sps:$4 sm:$0xff]   ;;  %v3308_v48 = vld [vmem:[%s4200_s1 + $0x158] sm:$0xff]  }
  0x13   : > { %2962 = vmatpush3.bf16.msra.mxu0 %v3271_v13  ;;  %2048 = vmatprep.mubr.bf16.mxu0 %v3291_v32  ;;  %v3300_v40 = vld [vmem:[%s4200_s1 + $0x148] sm:$0xff]   ;;  %v3305_v45 = vld [vmem:[%s4200_s1 + $0x110] sm:$0xff]   ;;  %v3309_v49 = vld [vmem:[%s4200_s1 + $0x118] sm:$0xff]  }
  0x14   : > { %2963 = vmatprep.subr.bf16.mxu0 %v3274_v16  ;;  %2089 = vmatprep.mubr.bf16.mxu1 %v3296_v36  ;;  %v3301_v41 = vld [vmem:[%s4200_s1 + $0x108] sm:$0xff]   ;;  %v3306_v46 = vld [vmem:[%s4200_s1 + $0x1d0] sm:$0xff]   ;;  %v3310_v50 = vld [vmem:[%s4200_s1 + $0x1d8] sm:$0xff]  }
  0x15   : > { %2984 = vmatpush3.bf16.msra.mxu1 %v3273_v15  ;;  %v3302_v42 = vld [vmem:[%s4200_s1 + $0x1c8] sm:$0xff]   ;;  %v3307_v47 = vld [vmem:[%s4200_s1 + $0x190] sm:$0xff]   ;;  %v3311_v51 = vld [vmem:[%s4200_s1 + $0x198] sm:$0xff]  }
  0x16   : > { %2985 = vmatprep.subr.bf16.mxu1 %v3276_v18  ;;  %v3303_v43 = vld [vmem:[%s4200_s1 + $0x188] sm:$0xff]   ;;  %v3312_v52 = vld [vmem:[%s4200_s1 + $0x160] sm:$0xff]   ;;  %v3320_v60 = vld [vmem:[%s4200_s1 + $0x170] sm:$0xff]  }
  0x17   : > { %2964 = vmatpush3.bf16.msra.mxu0 %v3275_v17  ;;  %v3313_v53 = vld [vmem:[%s4200_s1 + $0x120] sm:$0xff]   ;;  %v3316_v56 = vld [vmem:[%s4200_s1 + $0x168] sm:$0xff]   ;;  %v3321_v61 = vld [vmem:[%s4200_s1 + $0x130] sm:$0xff]  }
  0x18   : > { %2965 = vmatprep.subr.bf16.mxu0 %v3278_v20  ;;  %v3314_v54 = vld [vmem:[%s4200_s1 + $0x1e0] sm:$0xff]   ;;  %v3317_v57 = vld [vmem:[%s4200_s1 + $0x128] sm:$0xff]   ;;  %v3322_v62 = vld [vmem:[%s4200_s1 + $0x1f0] sm:$0xff]  }
  0x19   : > { %2986 = vmatpush3.bf16.msra.mxu1 %v3277_v19  ;;  %v3315_v55 = vld [vmem:[%s4200_s1 + $0x1a0] sm:$0xff]   ;;  %v3318_v58 = vld [vmem:[%s4200_s1 + $0x1e8] sm:$0xff]   ;;  %v3323_v63 = vld [vmem:[%s4200_s1 + $0x1b0] sm:$0xff]  }
  0x1a   : > { %2987 = vmatprep.subr.bf16.mxu1 %v3280_v22  ;;  %v3319_v59 = vld [vmem:[%s4200_s1 + $0x1a8] sm:$0xff]   ;;  %v3324_v0 = vld [vmem:[%s4200_s1 + $0x178] sm:$0xff]   ;;  %v3327_v3 = vld [vmem:[%s3646_s22 + $0x10] ss:$100 sps:$4 sm:$0xff]  }
  0x1b   : > { %2966 = vmatpush3.bf16.msra.mxu0 %v3279_v21  ;;  %v3325_v1 = vld [vmem:[%s4200_s1 + $0x138] sm:$0xff]   ;;  %v3331_v6 = vld [vmem:[%s4200_s1 + $0x240] sm:$0xff]   ;;  %v3338_v12 = vld [vmem:[%s4200_s1 + $0x248] sm:$0xff]  }
  0x1c   : > { %2967 = vmatprep.subr.bf16.mxu0 %v3282_v24  ;;  %v3326_v2 = vld [vmem:[%s4200_s1 + $0x1f8] sm:$0xff]   ;;  %v3335_v9 = vld [vmem:[%s4200_s1 + $0x200] sm:$0xff]   ;;  %v3339_v13 = vld [vmem:[%s4200_s1 + $0x208] sm:$0xff]  }
  0x1d   : > { %2988 = vmatpush3.bf16.msra.mxu1 %v3281_v23  ;;  %v3329_v4 = vld [vmem:[%s3646_s22 + $0x14] ss:$100 sps:$4 sm:$0xff]   ;;  %v3334_v8 = vld [vmem:[%s3646_s22 + $0x1c] ss:$100 sps:$4 sm:$0xff]   ;;  %v3340_v14 = vld [vmem:[%s4200_s1 + $0x2c8] sm:$0xff]  }
  0x1e   : > { %2989 = vmatprep.subr.bf16.mxu1 %v3284_v26  ;;  %v3330_v5 = vld [vmem:[%s4200_s1 + $0x1b8] sm:$0xff]   ;;  %v3336_v10 = vld [vmem:[%s4200_s1 + $0x2c0] sm:$0xff]   ;;  %v3341_v15 = vld [vmem:[%s4200_s1 + $0x288] sm:$0xff]  }
  0x1f   : > { %2968 = vmatpush3.bf16.msra.mxu0 %v3283_v25  ;;  %v3332_v7 = vld [vmem:[%s3646_s22 + $0x18] ss:$100 sps:$4 sm:$0xff]   ;;  %v3337_v11 = vld [vmem:[%s4200_s1 + $0x280] sm:$0xff]   ;;  %v3342_v16 = vld [vmem:[%s4200_s1 + $0x250] sm:$0xff]  }
  0x20   : > { %2969 = vmatprep.subr.bf16.mxu0 %v3286_v28  ;;  %v3343_v17 = vld [vmem:[%s4200_s1 + $0x210] sm:$0xff]   ;;  %v3346_v20 = vld [vmem:[%s4200_s1 + $0x258] sm:$0xff]   ;;  %v3350_v24 = vld [vmem:[%s4200_s1 + $0x260] sm:$0xff]  }
  0x21   : > { %2990 = vmatpush3.bf16.msra.mxu1 %v3285_v27  ;;  %v3344_v18 = vld [vmem:[%s4200_s1 + $0x2d0] sm:$0xff]   ;;  %v3347_v21 = vld [vmem:[%s4200_s1 + $0x218] sm:$0xff]   ;;  %v3351_v25 = vld [vmem:[%s4200_s1 + $0x220] sm:$0xff]  }
  0x22   : > { %2991 = vmatprep.subr.bf16.mxu1 %v3288_v30  ;;  %v3345_v19 = vld [vmem:[%s4200_s1 + $0x290] sm:$0xff]   ;;  %v3348_v22 = vld [vmem:[%s4200_s1 + $0x2d8] sm:$0xff]   ;;  %v3352_v26 = vld [vmem:[%s4200_s1 + $0x2e0] sm:$0xff]  }
  0x23   : > { %2970 = vmatpush3.bf16.msra.mxu0 %v3287_v29  ;;  %v3349_v23 = vld [vmem:[%s4200_s1 + $0x298] sm:$0xff]   ;;  %v3353_v27 = vld [vmem:[%s4200_s1 + $0x2a0] sm:$0xff]   ;;  %v3354_v28 = vld [vmem:[%s4200_s1 + $0x268] sm:$0xff]  }
  0x24   : > { %2999 = vmatprep.subr.bf16.mxu0 %v3293_v34  ;;  %v3355_v29 = vld [vmem:[%s4200_s1 + $0x228] sm:$0xff]   ;;  %v3358_v32 = vld [vmem:[%s4200_s1 + $0x270] sm:$0xff]   ;;  %v3362_v36 = vld [vmem:[%s4200_s1 + $0x278] sm:$0xff]  }
  0x25   : > { %2992 = vmatpush3.bf16.msra.mxu1 %v3292_v33  ;;  %v3356_v30 = vld [vmem:[%s4200_s1 + $0x2e8] sm:$0xff]   ;;  %v3359_v33 = vld [vmem:[%s4200_s1 + $0x230] sm:$0xff]  }
  0x26   : > { %2049 = vmatmul.mubr.bf16.vlgmr.msra.gmra.mrb[0].mxu0 %v3289_v31  ;;  %3021 = vmatprep.subr.bf16.mxu1 %v3298_v38  ;;  %v3357_v31 = vld [vmem:[%s4200_s1 + $0x2a8] sm:$0xff]   ;;  %v3360_v34 = vld [vmem:[%s4200_s1 + $0x2f0] sm:$0xff]   ;;  %v3364_v38 = vld [vmem:[%s4200_s1 + $0x2f8] sm:$0xff]  }
  0x27   : > { %3000 = vmatpush3.bf16.msra.mxu0 %v3297_v37  ;;  %2130 = vmatprep.mubr.bf16.mxu0 %v3329_v4  ;;  %v3363_v37 = vld [vmem:[%s4200_s1 + $0x238] sm:$0xff]   ;;  %v3396_v4 = vld [vmem:[%s4200_s1 + $0x370] sm:$0xff]  }
  0x28   : > { %2090 = vmatmul.mubr.bf16.vlgmr.msra.gmra.mrb[0].mxu1 %v3294_v35  ;;  %3001 = vmatprep.subr.bf16.mxu0 %v3300_v40  ;;  %v3361_v35 = vld [vmem:[%s4200_s1 + $0x2b0] sm:$0xff]   ;;  %v3367_v40 = vld [vmem:[%s3646_s22 + $0x24] ss:$100 sps:$4 sm:$0xff]  }
  0x29   : > { %3022 = vmatpush3.bf16.msra.mxu1 %v3299_v39  ;;  %2171 = vmatprep.mubr.bf16.mxu1 %v3334_v8  ;;  %v3365_v39 = vld [vmem:[%s3646_s22 + $0x20] ss:$100 sps:$4 sm:$0xff]   ;;  %v3400_v8 = vld [vmem:[%s4200_s1 + $0x378] sm:$0xff]  }
  0x2a   : > { %3023 = vmatprep.subr.bf16.mxu1 %v3302_v42  ;;  %v3369_v42 = vld [vmem:[%s4200_s1 + $0x340] sm:$0xff]  }
  0x2b   : > { %3002 = vmatpush3.bf16.msra.mxu0 %v3301_v41  ;;  %v3368_v41 = vld [vmem:[%s4200_s1 + $0x2b8] sm:$0xff]  }
  0x2c   : > { %3003 = vmatprep.subr.bf16.mxu0 %v3304_v44  ;;  %v3372_v44 = vld [vmem:[%s3646_s22 + $0x2c] ss:$100 sps:$4 sm:$0xff]  }
  0x2d   : > { %3024 = vmatpush3.bf16.msra.mxu1 %v3303_v43  ;;  %v3370_v43 = vld [vmem:[%s3646_s22 + $0x28] ss:$100 sps:$4 sm:$0xff]  }
  0x2e   : > { %3025 = vmatprep.subr.bf16.mxu1 %v3306_v46  ;;  %v3374_v46 = vld [vmem:[%s4200_s1 + $0x3c0] sm:$0xff]  }
  0x2f   : > { %3004 = vmatpush3.bf16.msra.mxu0 %v3305_v45  ;;  %v3373_v45 = vld [vmem:[%s4200_s1 + $0x300] sm:$0xff]  }
  0x30   : > { %3005 = vmatprep.subr.bf16.mxu0 %v3308_v48  ;;  %v3376_v48 = vld [vmem:[%s4200_s1 + $0x348] sm:$0xff]  }
  0x31   : > { %3026 = vmatpush3.bf16.msra.mxu1 %v3307_v47  ;;  %v3375_v47 = vld [vmem:[%s4200_s1 + $0x380] sm:$0xff]  }
  0x32   : > { %3027 = vmatprep.subr.bf16.mxu1 %v3310_v50  ;;  %v3378_v50 = vld [vmem:[%s4200_s1 + $0x3c8] sm:$0xff]  }
  0x33   : > { %3006 = vmatpush3.bf16.msra.mxu0 %v3309_v49  ;;  %v3377_v49 = vld [vmem:[%s4200_s1 + $0x308] sm:$0xff]  }
  0x34   : > { %3007 = vmatprep.subr.bf16.mxu0 %v3312_v52  ;;  %v3380_v52 = vld [vmem:[%s4200_s1 + $0x350] sm:$0xff]  }
  0x35   : > { %3028 = vmatpush3.bf16.msra.mxu1 %v3311_v51  ;;  %v3379_v51 = vld [vmem:[%s4200_s1 + $0x388] sm:$0xff]  }
  0x36   : > { %3029 = vmatprep.subr.bf16.mxu1 %v3314_v54  ;;  %v3382_v54 = vld [vmem:[%s4200_s1 + $0x3d0] sm:$0xff]  }
  0x37   : > { %3008 = vmatpush3.bf16.msra.mxu0 %v3313_v53  ;;  %v3381_v53 = vld [vmem:[%s4200_s1 + $0x310] sm:$0xff]  }
  0x38   : > { %3009 = vmatprep.subr.bf16.mxu0 %v3316_v56  ;;  %v3384_v56 = vld [vmem:[%s4200_s1 + $0x358] sm:$0xff]  }
  0x39   : > { %3030 = vmatpush3.bf16.msra.mxu1 %v3315_v55  ;;  %v3383_v55 = vld [vmem:[%s4200_s1 + $0x390] sm:$0xff]  }
  0x3a   : > { %3031 = vmatprep.subr.bf16.mxu1 %v3318_v58  ;;  %v3386_v58 = vld [vmem:[%s4200_s1 + $0x3d8] sm:$0xff]  }
  0x3b   : > { %3010 = vmatpush3.bf16.msra.mxu0 %v3317_v57  ;;  %v3385_v57 = vld [vmem:[%s4200_s1 + $0x318] sm:$0xff]  }
  0x3c   : > { %3011 = vmatprep.subr.bf16.mxu0 %v3320_v60  ;;  %v3388_v60 = vld [vmem:[%s4200_s1 + $0x360] sm:$0xff]  }
  0x3d   : > { %3032 = vmatpush3.bf16.msra.mxu1 %v3319_v59  ;;  %v3387_v59 = vld [vmem:[%s4200_s1 + $0x398] sm:$0xff]  }
  0x3e   : > { %3033 = vmatprep.subr.bf16.mxu1 %v3322_v62  ;;  %v3390_v62 = vld [vmem:[%s4200_s1 + $0x3e0] sm:$0xff]  }
  0x3f   : > { %3012 = vmatpush3.bf16.msra.mxu0 %v3321_v61  ;;  %v3389_v61 = vld [vmem:[%s4200_s1 + $0x320] sm:$0xff]  }
  0x40   : > { %3013 = vmatprep.subr.bf16.mxu0 %v3324_v0  ;;  %v3392_v0 = vld [vmem:[%s4200_s1 + $0x368] sm:$0xff]  }
  0x41   : > { %3034 = vmatpush3.bf16.msra.mxu1 %v3323_v63  ;;  %v3391_v63 = vld [vmem:[%s4200_s1 + $0x3a0] sm:$0xff]  }
  0x42   : > { %3035 = vmatprep.subr.bf16.mxu1 %v3326_v2  ;;  %v3394_v2 = vld [vmem:[%s4200_s1 + $0x3e8] sm:$0xff]  }
  0x43   : > { %3014 = vmatpush3.bf16.msra.mxu0 %v3325_v1  ;;  %v3393_v1 = vld [vmem:[%s4200_s1 + $0x328] sm:$0xff]  }
  0x44   : > { %3043 = vmatprep.subr.bf16.mxu0 %v3331_v6  ;;  %v3398_v6 = vld [vmem:[%s4200_s1 + $0x3f0] sm:$0xff]  }
  0x45   : > { %3036 = vmatpush3.bf16.msra.mxu1 %v3330_v5  ;;  %v3397_v5 = vld [vmem:[%s4200_s1 + $0x330] sm:$0xff]  }
  0x46   : > { %2131 = vmatmul.mubr.bf16.vlgmr.msra.gmra.mrb[4].mxu0 %v3327_v3  ;;  %3065 = vmatprep.subr.bf16.mxu1 %v3336_v10  ;;  %v3395_v3 = vld [vmem:[%s4200_s1 + $0x3a8] sm:$0xff]   ;;  %v3402_v10 = vld [vmem:[%s4200_s1 + $0x3f8] sm:$0xff]  }
  0x47   : > { %3044 = vmatpush3.bf16.msra.mxu0 %v3335_v9  ;;  %2212 = vmatprep.mubr.bf16.mxu0 %v3367_v40  ;;  %v3401_v9 = vld [vmem:[%s4200_s1 + $0x338] sm:$0xff]   ;;  %v3434_v40 = vld [vmem:[%s4200_s1 + $0x470] sm:$0xff]  }
  0x48   : > { %2172 = vmatmul.mubr.bf16.vlgmr.msra.gmra.mrb[4].mxu1 %v3332_v7  ;;  %3045 = vmatprep.subr.bf16.mxu0 %v3338_v12  ;;  %v3399_v7 = vld [vmem:[%s4200_s1 + $0x3b0] sm:$0xff]  }
  0x49   : > { %3066 = vmatpush3.bf16.msra.mxu1 %v3337_v11  ;;  %2253 = vmatprep.mubr.bf16.mxu1 %v3372_v44  ;;  %v3403_v11 = vld [vmem:[%s3646_s22 + $0x30] ss:$100 sps:$4 sm:$0xff]   ;;  %v3438_v44 = vld [vmem:[%s4200_s1 + $0x478] sm:$0xff]  }
  0x4a   : > { %3067 = vmatprep.subr.bf16.mxu1 %v3340_v14  ;;  %v3405_v12 = vld [vmem:[%s3646_s22 + $0x34] ss:$100 sps:$4 sm:$0xff]   ;;  %v3407_v14 = vld [vmem:[%s4200_s1 + $0x440] sm:$0xff]  }
  0x4b   : > { %3046 = vmatpush3.bf16.msra.mxu0 %v3339_v13  ;;  %v3406_v13 = vld [vmem:[%s4200_s1 + $0x3b8] sm:$0xff]  }
  0x4c   : > { %3047 = vmatprep.subr.bf16.mxu0 %v3342_v16  ;;  %v3410_v16 = vld [vmem:[%s3646_s22 + $0x3c] ss:$100 sps:$4 sm:$0xff]  }
  0x4d   : > { %3068 = vmatpush3.bf16.msra.mxu1 %v3341_v15  ;;  %v3408_v15 = vld [vmem:[%s3646_s22 + $0x38] ss:$100 sps:$4 sm:$0xff]  }
  0x4e   : > { %3069 = vmatprep.subr.bf16.mxu1 %v3344_v18  ;;  %v3412_v18 = vld [vmem:[%s4200_s1 + $0x4c0] sm:$0xff]  }
  0x4f   : > { %3048 = vmatpush3.bf16.msra.mxu0 %v3343_v17  ;;  %v3411_v17 = vld [vmem:[%s4200_s1 + $0x400] sm:$0xff]  }
  0x50   : > { %3049 = vmatprep.subr.bf16.mxu0 %v3346_v20  ;;  %v3414_v20 = vld [vmem:[%s4200_s1 + $0x448] sm:$0xff]  }
  0x51   : > { %3070 = vmatpush3.bf16.msra.mxu1 %v3345_v19  ;;  %v3413_v19 = vld [vmem:[%s4200_s1 + $0x480] sm:$0xff]  }
  0x52   : > { %3071 = vmatprep.subr.bf16.mxu1 %v3348_v22  ;;  %v3416_v22 = vld [vmem:[%s4200_s1 + $0x4c8] sm:$0xff]  }
  0x53   : > { %3050 = vmatpush3.bf16.msra.mxu0 %v3347_v21  ;;  %v3415_v21 = vld [vmem:[%s4200_s1 + $0x408] sm:$0xff]  }
  0x54   : > { %3051 = vmatprep.subr.bf16.mxu0 %v3350_v24  ;;  %v3418_v24 = vld [vmem:[%s4200_s1 + $0x450] sm:$0xff]  }
  0x55   : > { %3072 = vmatpush3.bf16.msra.mxu1 %v3349_v23  ;;  %v3417_v23 = vld [vmem:[%s4200_s1 + $0x488] sm:$0xff]  }
  0x56   : > { %3073 = vmatprep.subr.bf16.mxu1 %v3352_v26  ;;  %v3420_v26 = vld [vmem:[%s4200_s1 + $0x4d0] sm:$0xff]  }
  0x57   : > { %3052 = vmatpush3.bf16.msra.mxu0 %v3351_v25  ;;  %v3419_v25 = vld [vmem:[%s4200_s1 + $0x410] sm:$0xff]  }
  0x58   : > { %3053 = vmatprep.subr.bf16.mxu0 %v3354_v28  ;;  %v3422_v28 = vld [vmem:[%s4200_s1 + $0x458] sm:$0xff]  }
  0x59   : > { %3074 = vmatpush3.bf16.msra.mxu1 %v3353_v27  ;;  %v3421_v27 = vld [vmem:[%s4200_s1 + $0x490] sm:$0xff]  }
  0x5a   : > { %3075 = vmatprep.subr.bf16.mxu1 %v3356_v30  ;;  %v3424_v30 = vld [vmem:[%s4200_s1 + $0x4d8] sm:$0xff]  }
  0x5b   : > { %3054 = vmatpush3.bf16.msra.mxu0 %v3355_v29  ;;  %v3423_v29 = vld [vmem:[%s4200_s1 + $0x418] sm:$0xff]  }
  0x5c   : > { %3055 = vmatprep.subr.bf16.mxu0 %v3358_v32  ;;  %v3426_v32 = vld [vmem:[%s4200_s1 + $0x460] sm:$0xff]  }
  0x5d   : > { %3076 = vmatpush3.bf16.msra.mxu1 %v3357_v31  ;;  %v3425_v31 = vld [vmem:[%s4200_s1 + $0x498] sm:$0xff]  }
  0x5e   : > { %3077 = vmatprep.subr.bf16.mxu1 %v3360_v34  ;;  %v3428_v34 = vld [vmem:[%s4200_s1 + $0x4e0] sm:$0xff]  }
  0x5f   : > { %3056 = vmatpush3.bf16.msra.mxu0 %v3359_v33  ;;  %v3427_v33 = vld [vmem:[%s4200_s1 + $0x420] sm:$0xff]  }
  0x60   : > { %3057 = vmatprep.subr.bf16.mxu0 %v3362_v36  ;;  %v3430_v36 = vld [vmem:[%s4200_s1 + $0x468] sm:$0xff]  }
  0x61   : > { %3078 = vmatpush3.bf16.msra.mxu1 %v3361_v35  ;;  %v3429_v35 = vld [vmem:[%s4200_s1 + $0x4a0] sm:$0xff]  }
  0x62   : > { %3079 = vmatprep.subr.bf16.mxu1 %v3364_v38  ;;  %v3432_v38 = vld [vmem:[%s4200_s1 + $0x4e8] sm:$0xff]  }
  0x63   : > { %3058 = vmatpush3.bf16.msra.mxu0 %v3363_v37  ;;  %v3431_v37 = vld [vmem:[%s4200_s1 + $0x428] sm:$0xff]  }
  0x64   : > { %3087 = vmatprep.subr.bf16.mxu0 %v3369_v42  ;;  %v3436_v42 = vld [vmem:[%s4200_s1 + $0x4f0] sm:$0xff]  }
  0x65   : > { %3080 = vmatpush3.bf16.msra.mxu1 %v3368_v41  ;;  %v3435_v41 = vld [vmem:[%s4200_s1 + $0x430] sm:$0xff]  }
  0x66   : > { %2213 = vmatmul.mubr.bf16.vlgmr.msra.gmra.mrb[8].mxu0 %v3365_v39  ;;  %3109 = vmatprep.subr.bf16.mxu1 %v3374_v46  ;;  %v3433_v39 = vld [vmem:[%s4200_s1 + $0x4a8] sm:$0xff]   ;;  %v3440_v46 = vld [vmem:[%s4200_s1 + $0x4f8] sm:$0xff]  }
  0x67   : > { %3088 = vmatpush3.bf16.msra.mxu0 %v3373_v45  ;;  %2294 = vmatprep.mubr.bf16.mxu0 %v3405_v12  ;;  %v3439_v45 = vld [vmem:[%s4200_s1 + $0x438] sm:$0xff]   ;;  %v3472_v12 = vld [vmem:[%s4200_s1 + $0x570] sm:$0xff]  }
  0x68   : > { %2254 = vmatmul.mubr.bf16.vlgmr.msra.gmra.mrb[8].mxu1 %v3370_v43  ;;  %3089 = vmatprep.subr.bf16.mxu0 %v3376_v48  ;;  %v3437_v43 = vld [vmem:[%s4200_s1 + $0x4b0] sm:$0xff]   ;;  %v3443_v48 = vld [vmem:[%s3646_s22 + $0x44] ss:$100 sps:$4 sm:$0xff]  }
  0x69   : > { %3110 = vmatpush3.bf16.msra.mxu1 %v3375_v47  ;;  %2335 = vmatprep.mubr.bf16.mxu1 %v3410_v16  ;;  %v3441_v47 = vld [vmem:[%s3646_s22 + $0x40] ss:$100 sps:$4 sm:$0xff]   ;;  %v3476_v16 = vld [vmem:[%s4200_s1 + $0x578] sm:$0xff]  }
  0x6a   : > { %3111 = vmatprep.subr.bf16.mxu1 %v3378_v50  ;;  %v3445_v50 = vld [vmem:[%s4200_s1 + $0x540] sm:$0xff]  }
  0x6b   : > { %3090 = vmatpush3.bf16.msra.mxu0 %v3377_v49  ;;  %v3444_v49 = vld [vmem:[%s4200_s1 + $0x4b8] sm:$0xff]  }
  0x6c   : > { %3091 = vmatprep.subr.bf16.mxu0 %v3380_v52  ;;  %v3448_v52 = vld [vmem:[%s3646_s22 + $0x4c] ss:$100 sps:$4 sm:$0xff]  }
  0x6d   : > { %3112 = vmatpush3.bf16.msra.mxu1 %v3379_v51  ;;  %v3446_v51 = vld [vmem:[%s3646_s22 + $0x48] ss:$100 sps:$4 sm:$0xff]  }
  0x6e   : > { %3113 = vmatprep.subr.bf16.mxu1 %v3382_v54  ;;  %v3450_v54 = vld [vmem:[%s4200_s1 + $0x5c0] sm:$0xff]  }
  0x6f   : > { %3092 = vmatpush3.bf16.msra.mxu0 %v3381_v53  ;;  %v3449_v53 = vld [vmem:[%s4200_s1 + $0x500] sm:$0xff]  }
  0x70   : > { %3093 = vmatprep.subr.bf16.mxu0 %v3384_v56  ;;  %v3452_v56 = vld [vmem:[%s4200_s1 + $0x548] sm:$0xff]  }
  0x71   : > { %3114 = vmatpush3.bf16.msra.mxu1 %v3383_v55  ;;  %v3451_v55 = vld [vmem:[%s4200_s1 + $0x580] sm:$0xff]  }
  0x72   : > { %3115 = vmatprep.subr.bf16.mxu1 %v3386_v58  ;;  %v3454_v58 = vld [vmem:[%s4200_s1 + $0x5c8] sm:$0xff]  }
  0x73   : > { %3094 = vmatpush3.bf16.msra.mxu0 %v3385_v57  ;;  %v3453_v57 = vld [vmem:[%s4200_s1 + $0x508] sm:$0xff]  }
  0x74   : > { %3095 = vmatprep.subr.bf16.mxu0 %v3388_v60  ;;  %v3456_v60 = vld [vmem:[%s4200_s1 + $0x550] sm:$0xff]  }
  0x75   : > { %3116 = vmatpush3.bf16.msra.mxu1 %v3387_v59  ;;  %v3455_v59 = vld [vmem:[%s4200_s1 + $0x588] sm:$0xff]  }
  0x76   : > { %3117 = vmatprep.subr.bf16.mxu1 %v3390_v62  ;;  %v3458_v62 = vld [vmem:[%s4200_s1 + $0x5d0] sm:$0xff]  }
  0x77   : > { %3096 = vmatpush3.bf16.msra.mxu0 %v3389_v61  ;;  %v3457_v61 = vld [vmem:[%s4200_s1 + $0x510] sm:$0xff]  }
  0x78   : > { %3097 = vmatprep.subr.bf16.mxu0 %v3392_v0  ;;  %v3460_v0 = vld [vmem:[%s4200_s1 + $0x558] sm:$0xff]  }
  0x79   : > { %3118 = vmatpush3.bf16.msra.mxu1 %v3391_v63  ;;  %v3459_v63 = vld [vmem:[%s4200_s1 + $0x590] sm:$0xff]  }
  0x7a   : > { %3119 = vmatprep.subr.bf16.mxu1 %v3394_v2  ;;  %v3462_v2 = vld [vmem:[%s4200_s1 + $0x5d8] sm:$0xff]  }
  0x7b   : > { %3098 = vmatpush3.bf16.msra.mxu0 %v3393_v1  ;;  %v3461_v1 = vld [vmem:[%s4200_s1 + $0x518] sm:$0xff]  }
  0x7c   : > { %3099 = vmatprep.subr.bf16.mxu0 %v3396_v4  ;;  %v3464_v4 = vld [vmem:[%s4200_s1 + $0x560] sm:$0xff]  }
  0x7d   : > { %3120 = vmatpush3.bf16.msra.mxu1 %v3395_v3  ;;  %v3463_v3 = vld [vmem:[%s4200_s1 + $0x598] sm:$0xff]  }
  0x7e   : > { %3121 = vmatprep.subr.bf16.mxu1 %v3398_v6  ;;  %v3466_v6 = vld [vmem:[%s4200_s1 + $0x5e0] sm:$0xff]  }
  0x7f   : > { %3100 = vmatpush3.bf16.msra.mxu0 %v3397_v5  ;;  %v3465_v5 = vld [vmem:[%s4200_s1 + $0x520] sm:$0xff]  }
  0x80   : > { %3101 = vmatprep.subr.bf16.mxu0 %v3400_v8  ;;  %v3468_v8 = vld [vmem:[%s4200_s1 + $0x568] sm:$0xff]  }
  0x81   : > { %3122 = vmatpush3.bf16.msra.mxu1 %v3399_v7  ;;  %v3467_v7 = vld [vmem:[%s4200_s1 + $0x5a0] sm:$0xff]  }
  0x82   : > { %3123 = vmatprep.subr.bf16.mxu1 %v3402_v10  ;;  %v3470_v10 = vld [vmem:[%s4200_s1 + $0x5e8] sm:$0xff]  }
  0x83   : > { %3102 = vmatpush3.bf16.msra.mxu0 %v3401_v9  ;;  %v3469_v9 = vld [vmem:[%s4200_s1 + $0x528] sm:$0xff]  }
  0x84   : > { %3131 = vmatprep.subr.bf16.mxu0 %v3407_v14  ;;  %v3474_v14 = vld [vmem:[%s4200_s1 + $0x5f0] sm:$0xff]  }
  0x85   : > { %3124 = vmatpush3.bf16.msra.mxu1 %v3406_v13  ;;  %v3473_v13 = vld [vmem:[%s4200_s1 + $0x530] sm:$0xff]  }
  0x86   : > { %2295 = vmatmul.mubr.bf16.vlgmr.msra.gmra.mrb[12].mxu0 %v3403_v11  ;;  %3153 = vmatprep.subr.bf16.mxu1 %v3412_v18  ;;  %v3471_v11 = vld [vmem:[%s4200_s1 + $0x5a8] sm:$0xff]   ;;  %v3478_v18 = vld [vmem:[%s4200_s1 + $0x5f8] sm:$0xff]  }
  0x87   : > { %3132 = vmatpush3.bf16.msra.mxu0 %v3411_v17  ;;  %2376 = vmatprep.mubr.bf16.mxu0 %v3443_v48  ;;  %v3477_v17 = vld [vmem:[%s4200_s1 + $0x538] sm:$0xff]  }
  0x88   : > { %2336 = vmatmul.mubr.bf16.vlgmr.msra.gmra.mrb[12].mxu1 %v3408_v15  ;;  %3133 = vmatprep.subr.bf16.mxu0 %v3414_v20  ;;  %v3475_v15 = vld [vmem:[%s4200_s1 + $0x5b0] sm:$0xff]  }
  0x89   : > { %3154 = vmatpush3.bf16.msra.mxu1 %v3413_v19  ;;  %2417 = vmatprep.mubr.bf16.mxu1 %v3448_v52  ;;  %v3479_v19 = vld [vmem:[%s3646_s22 + $0x50] ss:$100 sps:$4 sm:$0xff]  }
  0x8a   : > { %3155 = vmatprep.subr.bf16.mxu1 %v3416_v22  ;;  %v3481_v20 = vld [vmem:[%s3646_s22 + $0x54] ss:$100 sps:$4 sm:$0xff]   ;;  %v3501_v22 = vmov 0.0  }
  0x8b   : > { %3134 = vmatpush3.bf16.msra.mxu0 %v3415_v21  ;;  %v3482_v21 = vld [vmem:[%s4200_s1 + $0x5b8] sm:$0xff]  }
  0x8c   : > { %3135 = vmatprep.subr.bf16.mxu0 %v3418_v24  ;;  %v3485_v24 = vld [vmem:[%s3646_s22 + $0x5c] ss:$100 sps:$4 sm:$0xff]  }
  0x8d   : > { %3156 = vmatpush3.bf16.msra.mxu1 %v3417_v23  ;;  %v3483_v23 = vld [vmem:[%s3646_s22 + $0x58] ss:$100 sps:$4 sm:$0xff]  }
  0x8e   : > { %3157 = vmatprep.subr.bf16.mxu1 %v3420_v26  ;;  %v3487_v26 = vld [vmem:[%s4200_s1 + $0x608] sm:$0xff]  }
  0x8f   : > { %3136 = vmatpush3.bf16.msra.mxu0 %v3419_v25  ;;  %v3486_v25 = vld [vmem:[%s4200_s1 + $0x600] sm:$0xff]  }
  0x90   : > { %3137 = vmatprep.subr.bf16.mxu0 %v3422_v28  ;;  %v3489_v28 = vld [vmem:[%s4200_s1 + $0x618] sm:$0xff]  }
  0x91   : > { %3158 = vmatpush3.bf16.msra.mxu1 %v3421_v27  ;;  %v3488_v27 = vld [vmem:[%s4200_s1 + $0x610] sm:$0xff]  }
  0x92   : > { %3159 = vmatprep.subr.bf16.mxu1 %v3424_v30 }
  0x93   : > { %3138 = vmatpush3.bf16.msra.mxu0 %v3423_v29  ;;  %v3490_v29 = vld [vmem:[%s3646_s22 + $0x60] ss:$100 sps:$4 sm:$0xff]  }
  0x94   : > { %3139 = vmatprep.subr.bf16.mxu0 %v3426_v32 }
  0x95   : > { %3160 = vmatpush3.bf16.msra.mxu1 %v3425_v31  ;;  %v2720_v31 = vld [vmem:[%s4201_s2] ss:$0 sm:$0xff] }
  0x96   : > { %3161 = vmatprep.subr.bf16.mxu1 %v3428_v34 }
  0x97   : > { %3140 = vmatpush3.bf16.msra.mxu0 %v3427_v33 }
  0x98   : > { %3141 = vmatprep.subr.bf16.mxu0 %v3430_v36 }
  0x99   : > { %3162 = vmatpush3.bf16.msra.mxu1 %v3429_v35 }
  0x9a   : > { %3163 = vmatprep.subr.bf16.mxu1 %v3432_v38 }
  0x9b   : > { %3142 = vmatpush3.bf16.msra.mxu0 %v3431_v37 }
  0x9c   : > { %3143 = vmatprep.subr.bf16.mxu0 %v3434_v40 }
  0x9d   : > { %3164 = vmatpush3.bf16.msra.mxu1 %v3433_v39 }
  0x9e   : > { %3165 = vmatprep.subr.bf16.mxu1 %v3436_v42 }
  0x9f   : > { %3144 = vmatpush3.bf16.msra.mxu0 %v3435_v41 }
  0xa0   : > { %3145 = vmatprep.subr.bf16.mxu0 %v3438_v44 }
  0xa1   : > { %3166 = vmatpush3.bf16.msra.mxu1 %v3437_v43 }
  0xa2   : > { %3167 = vmatprep.subr.bf16.mxu1 %v3440_v46 }
  0xa3   : > { %3146 = vmatpush3.bf16.msra.mxu0 %v3439_v45 }
  0xa4   : > { %3175 = vmatprep.subr.bf16.mxu0 %v3445_v50 }
  0xa5   : > { %3168 = vmatpush3.bf16.msra.mxu1 %v3444_v49 }
  0xa6   : > { %2377 = vmatmul.mubr.bf16.vlgmr.msra.gmra.mrb[16].mxu0 %v3441_v47  ;;  %3197 = vmatprep.subr.bf16.mxu1 %v3450_v54 }
  0xa7   : > { %3176 = vmatpush3.bf16.msra.mxu0 %v3449_v53  ;;  %2458 = vmatprep.mubr.bf16.mxu0 %v3481_v20 }
  0xa8   : > { %2418 = vmatmul.mubr.bf16.vlgmr.msra.gmra.mrb[16].mxu1 %v3446_v51  ;;  %3177 = vmatprep.subr.bf16.mxu0 %v3452_v56 }
  0xa9   : > { %3198 = vmatpush3.bf16.msra.mxu1 %v3451_v55  ;;  %2499 = vmatprep.mubr.bf16.mxu1 %v3485_v24 }
  0xaa   : > { %3199 = vmatprep.subr.bf16.mxu1 %v3454_v58 }
  0xab   : > { %3178 = vmatpush3.bf16.msra.mxu0 %v3453_v57 }
  0xac   : > { %3179 = vmatprep.subr.bf16.mxu0 %v3456_v60 }
  0xad   : > { %3200 = vmatpush3.bf16.msra.mxu1 %v3455_v59 }
  0xae   : > { %3201 = vmatprep.subr.bf16.mxu1 %v3458_v62 }
  0xaf   : > { %3180 = vmatpush3.bf16.msra.mxu0 %v3457_v61 }
  0xb0   : > { %3181 = vmatprep.subr.bf16.mxu0 %v3460_v0  ;;  %v3492_v0 = vld [vmem:[%s4203_s4 + $0x8] sm:$0xff]  }
  0xb1   : > { %3202 = vmatpush3.bf16.msra.mxu1 %v3459_v63  ;;  %v3491_v63 = vld [vmem:[%s4203_s4] sm:$0xff]  }
  0xb2   : > { %3203 = vmatprep.subr.bf16.mxu1 %v3462_v2 }
  0xb3   : > { %3182 = vmatpush3.bf16.msra.mxu0 %v3461_v1 }
  0xb4   : > { %3183 = vmatprep.subr.bf16.mxu0 %v3464_v4 }
  0xb5   : > { %3204 = vmatpush3.bf16.msra.mxu1 %v3463_v3 }
  0xb6   : > { %3205 = vmatprep.subr.bf16.mxu1 %v3466_v6 }
  0xb7   : > { %3184 = vmatpush3.bf16.msra.mxu0 %v3465_v5 }
  0xb8   : > { %3185 = vmatprep.subr.bf16.mxu0 %v3468_v8 }
  0xb9   : > { %3206 = vmatpush3.bf16.msra.mxu1 %v3467_v7 }
  0xba   : > { %3207 = vmatprep.subr.bf16.mxu1 %v3470_v10 }
  0xbb   : > { %3186 = vmatpush3.bf16.msra.mxu0 %v3469_v9 }
  0xbc   : > { %3187 = vmatprep.subr.bf16.mxu0 %v3472_v12 }
  0xbd   : > { %3208 = vmatpush3.bf16.msra.mxu1 %v3471_v11 }
  0xbe   : > { %3209 = vmatprep.subr.bf16.mxu1 %v3474_v14 }
  0xbf   : > { %3188 = vmatpush3.bf16.msra.mxu0 %v3473_v13 }
  0xc0   : > { %3189 = vmatprep.subr.bf16.mxu0 %v3476_v16 }
  0xc1   : > { %3210 = vmatpush3.bf16.msra.mxu1 %v3475_v15 }
  0xc2   : > { %3211 = vmatprep.subr.bf16.mxu1 %v3478_v18 }
  0xc3   : > { %3190 = vmatpush3.bf16.msra.mxu0 %v3477_v17 }
  0xc4   : > { %3227 = vmatprep.subr.bf16.mxu0 %v3501_v22 }
  0xc5   : > { %3212 = vmatpush3.bf16.msra.mxu1 %v3482_v21 }
  0xc6   : > { %2459 = vmatmul.mubr.bf16.vlgmr.msra.gmra.mrb[20].mxu0 %v3479_v19  ;;  %3239 = vmatprep.subr.bf16.mxu1 %v3501_v22 }
  0xc7   : > { %3235 = vmatprep.mubr.msk.bf16.mxu0 %vm3502_vm0, %v3501_v22  ;;  %3228 = vmatpush3.bf16.msra.mxu0 %v3486_v25 }
  0xc8   : > { %2500 = vmatmul.mubr.bf16.vlgmr.msra.gmra.mrb[20].mxu1 %v3483_v23  ;;  %3229 = vmatprep.subr.bf16.mxu0 %v3501_v22 }
  0xc9   : > { %3243 = vmatprep.mubr.msk.bf16.mxu1 %vm3502_vm0, %v3501_v22  ;;  %3240 = vmatpush3.bf16.msra.mxu1 %v3491_v63 }
  0xca   : > { %3241 = vmatprep.subr.bf16.mxu1 %v3501_v22 }
  0xcb   : > { %3230 = vmatpush3.bf16.msra.mxu0 %v3487_v26 }
  0xcc   : > { %3231 = vmatprep.subr.bf16.mxu0 %v3501_v22 }
  0xcd   : > { %3242 = vmatpush3.bf16.msra.mxu1 %v3492_v0 }
  0xcf   : > { %3232 = vmatpush3.bf16.msra.mxu0 %v3488_v27 }
  0xd0   : > { %3233 = vmatprep.subr.bf16.mxu0 %v3501_v22 }
  0xd3   : > { %3234 = vmatpush3.bf16.msra.mxu0 %v3489_v28 }
  0xd6   : > { %3236 = vmatmul.mubr.msk.bf16.vlgmr.msra.gmra.mrb[24].mxu0 %vm2012_vm1, %v3490_v29 }
  0xf9   : > { %v2971_v30 = vpop.f32.mrb[0].mxu0 }
  0xfa   : > { %v2972_v32 = vpop.f32.mrb[1].mxu0 }
  0xfb   : > { %v2973_v33 = vadd.f32 %v2972_v32, %v2971_v30  ;;  %v2974_v34 = vpop.f32.mrb[2].mxu0  ;;  %v2993_v35 = vpop.f32.mrb[0].mxu1 }
  0xfc   : > { %v2975_v36 = vpop.f32.mrb[3].mxu0  ;;  %v2994_v39 = vpop.f32.mrb[1].mxu1 }
  0xfd   : > { %v2051_v37 = vadd.f32 %v2973_v33, %v2720_v31  ;;  %v2976_v38 = vadd.f32 %v2975_v36, %v2974_v34  ;;  %v2995_v40 = vadd.f32 %v2994_v39, %v2993_v35  ;;  %v2996_v41 = vpop.f32.mrb[2].mxu1 }
  0xfe   : > { %v2997_v43 = vpop.f32.mrb[3].mxu1 }
  0xff   : > { %v2054_v42 = vadd.f32 %v2976_v38, %v2720_v31  ;;  %v2092_v44 = vadd.f32 %v2995_v40, %v2051_v37  ;;  %v2998_v45 = vadd.f32 %v2997_v43, %v2996_v41 }
 0x101   : > { %v2095_v46 = vadd.f32 %v2998_v45, %v2054_v42 }
 0x119   : > { %v3015_v47 = vpop.f32.mrb[4].mxu0 }
 0x11a   : > { %v3016_v48 = vpop.f32.mrb[5].mxu0 }
 0x11b   : > { %v3017_v49 = vadd.f32 %v3016_v48, %v3015_v47  ;;  %v3018_v50 = vpop.f32.mrb[6].mxu0  ;;  %v3037_v53 = vpop.f32.mrb[4].mxu1 }
 0x11c   : > { %v3019_v51 = vpop.f32.mrb[7].mxu0  ;;  %v3038_v55 = vpop.f32.mrb[5].mxu1 }
 0x11d   : > { %v2133_v52 = vadd.f32 %v3017_v49, %v2092_v44  ;;  %v3020_v54 = vadd.f32 %v3019_v51, %v3018_v50  ;;  %v3039_v57 = vadd.f32 %v3038_v55, %v3037_v53  ;;  %v3040_v58 = vpop.f32.mrb[6].mxu1 }
 0x11e   : > { %v3041_v59 = vpop.f32.mrb[7].mxu1 }
 0x11f   : > { %v2136_v56 = vadd.f32 %v3020_v54, %v2095_v46  ;;  %v2174_v60 = vadd.f32 %v3039_v57, %v2133_v52  ;;  %v3042_v61 = vadd.f32 %v3041_v59, %v3040_v58 }
 0x121   : > { %v2177_v62 = vadd.f32 %v3042_v61, %v2136_v56 }
 0x139   : > { %v3059_v1 = vpop.f32.mrb[8].mxu0 }
 0x13a   : > { %v3060_v2 = vpop.f32.mrb[9].mxu0 }
 0x13b   : > { %v3061_v3 = vadd.f32 %v3060_v2, %v3059_v1  ;;  %v3062_v4 = vpop.f32.mrb[10].mxu0  ;;  %v3081_v5 = vpop.f32.mrb[8].mxu1  ;;  %v2943_v2 = vld [vmem:[%s4202_s3] ss:$0 sm:$0xff] }
 0x13c   : > { %v3063_v6 = vpop.f32.mrb[11].mxu0  ;;  %v3082_v9 = vpop.f32.mrb[9].mxu1 }
 0x13d   : > { %v2215_v7 = vadd.f32 %v3061_v3, %v2174_v60  ;;  %v3064_v8 = vadd.f32 %v3063_v6, %v3062_v4  ;;  %v3083_v10 = vadd.f32 %v3082_v9, %v3081_v5  ;;  %v3084_v11 = vpop.f32.mrb[10].mxu1 }
 0x13e   : > { %v3085_v13 = vpop.f32.mrb[11].mxu1 }
 0x13f   : > { %v2218_v12 = vadd.f32 %v3064_v8, %v2177_v62  ;;  %v2256_v14 = vadd.f32 %v3083_v10, %v2215_v7  ;;  %v3086_v15 = vadd.f32 %v3085_v13, %v3084_v11  ;;  %v2944_v13 = vld [vmem:[%s4204_s5] ss:$0 sm:$0xff] }
 0x141   : > { %v2259_v16 = vadd.f32 %v3086_v15, %v2218_v12  ;;  %v2948_v15 = vld [vmem:[%s4205_s6] ss:$0 sm:$0xff] }
 0x159   : > { %v3103_v17 = vpop.f32.mrb[12].mxu0 }
 0x15a   : > { %v3104_v18 = vpop.f32.mrb[13].mxu0 }
 0x15b   : > { %v3105_v19 = vadd.f32 %v3104_v18, %v3103_v17  ;;  %v3106_v20 = vpop.f32.mrb[14].mxu0  ;;  %v3125_v21 = vpop.f32.mrb[12].mxu1 }
 0x15c   : > { %v3107_v22 = vpop.f32.mrb[15].mxu0  ;;  %v3126_v25 = vpop.f32.mrb[13].mxu1 }
 0x15d   : > { %v2297_v23 = vadd.f32 %v3105_v19, %v2256_v14  ;;  %v3108_v24 = vadd.f32 %v3107_v22, %v3106_v20  ;;  %v3127_v26 = vadd.f32 %v3126_v25, %v3125_v21  ;;  %v3128_v27 = vpop.f32.mrb[14].mxu1 }
 0x15e   : > { %v3129_v29 = vpop.f32.mrb[15].mxu1 }
 0x15f   : > { %v2300_v28 = vadd.f32 %v3108_v24, %v2259_v16  ;;  %v2338_v30 = vadd.f32 %v3127_v26, %v2297_v23  ;;  %v3130_v31 = vadd.f32 %v3129_v29, %v3128_v27 }
 0x161   : > { %v2341_v32 = vadd.f32 %v3130_v31, %v2300_v28 }
 0x179   : > { %v3147_v33 = vpop.f32.mrb[16].mxu0 }
 0x17a   : > { %v3148_v34 = vpop.f32.mrb[17].mxu0 }
 0x17b   : > { %v3149_v35 = vadd.f32 %v3148_v34, %v3147_v33  ;;  %v3150_v36 = vpop.f32.mrb[18].mxu0  ;;  %v3169_v39 = vpop.f32.mrb[16].mxu1 }
 0x17c   : > { %v3151_v37 = vpop.f32.mrb[19].mxu0  ;;  %v3170_v41 = vpop.f32.mrb[17].mxu1 }
 0x17d   : > { %v2379_v38 = vadd.f32 %v3149_v35, %v2338_v30  ;;  %v3152_v40 = vadd.f32 %v3151_v37, %v3150_v36  ;;  %v3171_v43 = vadd.f32 %v3170_v41, %v3169_v39  ;;  %v3172_v44 = vpop.f32.mrb[18].mxu1 }
 0x17e   : > { %v3173_v45 = vpop.f32.mrb[19].mxu1 }
 0x17f   : > { %v2382_v42 = vadd.f32 %v3152_v40, %v2341_v32  ;;  %v2420_v46 = vadd.f32 %v3171_v43, %v2379_v38  ;;  %v3174_v47 = vadd.f32 %v3173_v45, %v3172_v44 }
 0x181   : > { %v2423_v48 = vadd.f32 %v3174_v47, %v2382_v42 }
 0x199   : > { %v3191_v49 = vpop.f32.mrb[20].mxu0 }
 0x19a   : > { %v3192_v50 = vpop.f32.mrb[21].mxu0 }
 0x19b   : > { %v3193_v51 = vadd.f32 %v3192_v50, %v3191_v49  ;;  %v3194_v52 = vpop.f32.mrb[22].mxu0  ;;  %v3213_v53 = vpop.f32.mrb[20].mxu1 }
 0x19c   : > { %v3195_v54 = vpop.f32.mrb[23].mxu0  ;;  %v3214_v57 = vpop.f32.mrb[21].mxu1 }
 0x19d   : > { %v2461_v55 = vadd.f32 %v3193_v51, %v2420_v46  ;;  %v3196_v56 = vadd.f32 %v3195_v54, %v3194_v52  ;;  %v3215_v58 = vadd.f32 %v3214_v57, %v3213_v53  ;;  %v3216_v59 = vpop.f32.mrb[22].mxu1 }
 0x19e   : > { %v3217_v61 = vpop.f32.mrb[23].mxu1 }
 0x19f   : > { %v2464_v60 = vadd.f32 %v3196_v56, %v2423_v48  ;;  %v3218_v62 = vadd.f32 %v3217_v61, %v3216_v59  ;;  %v2502_v63 = vadd.f32 %v3215_v58, %v2461_v55 }
 0x1a1   : > { %v2505_v0 = vadd.f32 %v3218_v62, %v2464_v60 }
 0x1a9   : > { %v2542_v1 = vpop.f32.mrb[24].mxu0 }
 0x1aa   : > { %v2543_v3 = vadd.f32 %v2542_v1, %v2502_v63  ;;  %v3237_v4 = vpop.f32.mrb[25].mxu0 }
 0x1ab   : > { %v2545_v5 = vpop.f32.mrb[26].mxu0 }
 0x1ac   : > { %v2558_v6 = vmul.f32 %v2943_v2, %v2543_v3  ;;  %v2546_v7 = vadd.f32 %v2545_v5, %v2505_v0  ;;  %v3238_v8 = vpop.f32.mrb[27].mxu0  ;;  %vm2549_vm2 = vcmp.ge.f32.partialorder %v2543_v3, 0.0 }
 0x1ae   : > { %vm2550_vm3 = vcmp.ge.f32.partialorder %v2546_v7, 0.0  ;;  %v2559_v9 = vmul.f32 %v2943_v2, %v2546_v7  ;;  %v2560_v10 = vsel %vm2549_vm2, %v2543_v3, %v2558_v6 }
 0x1b0   : > { %v2561_v11 = vsel %vm2550_vm3, %v2546_v7, %v2559_v9 }
 0x1b1   : > { %v2562_v12 = vpack.c.bf16 %v2561_v11, %v2560_v10 }
 0x1b3   : > { %3244 = vmatmul.mubr.msk.bf16.vlgmr.msra.gmra.mrb[24].mxu1 %vm2586_vm4, %v2562_v12 }
 0x286   : > { %v2624_v14 = vpop.f32.mrb[24].mxu1 }
 0x287   : > { %v2625_v16 = vadd.f32 %v2944_v13, %v2624_v14  ;;  %v3245_v17 = vpop.f32.mrb[25].mxu1 }
 0x288   : > { %v2627_v18 = vpop.f32.mrb[26].mxu1 }
 0x289   : > { %vm2631_vm5 = vcmp.ge.f32.partialorder %v2625_v16, 0.0  ;;  %v2640_v19 = vmul.f32 %v2948_v15, %v2625_v16  ;;  %v2628_v20 = vadd.f32 %v2944_v13, %v2627_v18  ;;  %v3246_v21 = vpop.f32.mrb[27].mxu1 }
 0x28b   : > { %v2642_v22 = vsel %vm2631_vm5, %v2625_v16, %v2640_v19  ;;  %vm2632_vm7 = vcmp.ge.f32.partialorder %v2628_v20, 0.0  ;;  %v2641_v23 = vmul.f32 %v2948_v15, %v2628_v20 }
 0x28c   : > { %v2953_v24 = vpack.c.bf16 %v2642_v22, %v2642_v22 }
 0x28d   : > { %v2643_v25 = vsel %vm2632_vm7, %v2628_v20, %v2641_v23 }
 0x28e   : > { %2653 = vst.msk [vmem:[%s283_s11] sm:$0xf] %vm2652_vm6, %v2953_v24  ;;  %v2954_v26 = vpack.c.bf16 %v2643_v25, %v2643_v25 }
 0x290   : > { %2654 = vst.msk [vmem:[%s283_s11 + $0x4] sm:$0xf] %vm2652_vm6, %v2954_v26 }
 0x291 PF: > { %s17_s24 = sadd.s32 1, %s3499_s24  }
 0x292   : > { %p14_p4 = scmp.ge.s32.totalorder %s17_s24, 4  }
 0x294   :  { %16 = sbr.rel (!%p14_p4) target bundleno = 1 (0x1), region = 78 }

// kernel: tile.8
= control target key start
LH: loop header
LB: loop body
LE: loop exit
PB: predicated region body
PF: predicated region fallthrough
CT: control target
= control target key end

     0   :  { %s22_s0 = inlined_call_operand.vmem [shape: f32[3], index: 0, kind: input, shape index: {}]   ;;  %s23_s1 = inlined_call_operand.vmem [shape: f32[4,3], index: 1, kind: output, shape index: {}]  }
   0x1   :  { %v4_v0 = vld [vmem:[%s22_s0] ss:$0 sm:$0xff] }
   0x2   :  { %5 = vst [vmem:[%s23_s1] sm:$0xf] %v4_v0 }

// kernel: tile.9
= control target key start
LH: loop header
LB: loop body
LE: loop exit
PB: predicated region body
PF: predicated region fallthrough
CT: control target
= control target key end

     0   :  { %vm7_vm0 = vcmask 23552   ;;  %s37_s8 = smov 3   ;;  %s38_s9 = smov 6   ;;  %vm13_vm1 = vcmask 97352   ;;  %vm19_vm2 = vcmask 72752   ;;  %vm25_vm3 = vcmask 48152   ;;  %s55_s0 = inlined_call_operand.vmem [shape: f32[4,3], index: 0, kind: input, shape index: {}]   ;;  %s56_s1 = inlined_call_operand.vmem [shape: f32[1,12], index: 1, kind: output, shape index: {}]  }
   0x1   :  { %v4_v0 = vld [vmem:[%s55_s0] sm:$0xf]  ;;  %s36_s0 = smov 9  }
   0x2   :  { %5 = vst [vmem:[#allocation1] sm:$0xf] %v4_v0 }
   0x9   :  { %v10_v1 = vld [vmem:[#allocation1 + $0x3] sm:$0x1]   ;;  %v22_v2 = vld [vmem:[#allocation1 + $0x1] sm:$0x1]   ;;  %v6_v3 = vld [vmem:[#allocation1] sm:$0x1]  }
   0xa   :  { %11 = vrot.lane.b32.xlu0 %v10_v1, %s36_s0  ;;  %23 = vrot.lane.b32.xlu1 %v22_v2, %s37_s8  ;;  %v16_v4 = vld [vmem:[#allocation1 + $0x2] sm:$0x1]   ;;  %8 = vst.msk [vmem:[#allocation0] sm:$0x1] %vm7_vm0, %v6_v3  }
   0xe   :  { %17 = vrot.lane.b32.xlu0 %v16_v4, %s38_s9 }
  0x7c   :  { %v12_v5 = vpop.permute.xlu0 %11   ;;  %v24_v6 = vpop.permute.xlu1 %23  }
  0x7d   :  { %14 = vst.msk [vmem:[#allocation0] sm:$0x1] %vm13_vm1, %v12_v5  }
  0x80   :  { %v18_v7 = vpop.permute.xlu0 %17  }
  0x81   :  { %20 = vst.msk [vmem:[#allocation0] sm:$0x1] %vm19_vm2, %v18_v7  }
  0x82   :  { %26 = vst.msk [vmem:[#allocation0] sm:$0x1] %vm25_vm3, %v24_v6  }
  0x89   :  { %v30_v8 = vld [vmem:[#allocation0] sm:$0x1] }
  0x8a   :  { %32 = vst [vmem:[%s56_s1] sm:$0x1] %v30_v8 }

// kernel: fast_arcnn_forward.5
= control target key start
LH: loop header
LB: loop body
LE: loop exit
PB: predicated region body
PF: predicated region fallthrough
CT: control target
= control target key end

     0   :  { %s448_s12 = smov 0   ;;  %s498_s0 = inlined_call_operand.vmem [shape: bf16[32,144], index: 0, kind: input, shape index: {}]   ;;  %s499_s1 = inlined_call_operand.vmem [shape: bf16[144,12], index: 1, kind: input, shape index: {}]   ;;  %s500_s2 = inlined_call_operand.vmem [shape: f32[1,12], index: 2, kind: input, shape index: {}]   ;;  %s501_s3 = inlined_call_operand.vmem [shape: f32[32,12], index: 3, kind: output, shape index: {}]  }
   0x1 LB: > { %s372_s13 = sadd.s32 4294967295, %s425_s12   ;;  %p376_p0 = scmp.ge.s32.totalorder %s425_s12, 1  ;;  %s425_s12 = sphi %s448_s12, %s13_s12  }
   0x2   : > { %p139_p1 = scmp.lt.s32.totalorder %s425_s12, 3 }
   0x4   : > { %p140_p2 = pnand %p376_p0, %p139_p1 }
   0x5   : > { %v407_v0 = vld [vmem:[%s499_s1] sm:$0xff] (!%p140_p2)   ;;  %v427_v1 = vmov (!%p140_p2), 0   ;;  %s377_s16 = sshll.u32 (!%p140_p2), %s372_s13, 1  ;;  %v408_v2 = vld [vmem:[%s499_s1 + $0x8] sm:$0xff] (!%p140_p2)   ;;  %v409_v3 = vld [vmem:[%s499_s1 + $0x10] sm:$0xff] (!%p140_p2)   ;;  %vm268_vm0 = vcmask (!%p140_p2), 130048  }
   0x6   : > { %143 = sbr.rel (%p140_p2) target bundleno = 259 (0x103), region = 32  ;;  %272 = vmatprep.subr.bf16.mxu0 (!%p140_p2), %v427_v1  ;;  %p165_p3 = scmp.lt.s32.totalorder (!%p140_p2), %s377_s16, 3  ;;  %v410_v4 = vld [vmem:[%s499_s1 + $0x18] sm:$0xff] (!%p140_p2)   ;;  %v411_v6 = vld [vmem:[%s499_s1 + $0x20] sm:$0xff] (!%p140_p2)   ;;  %v412_v7 = vld [vmem:[%s499_s1 + $0x28] sm:$0xff] (!%p140_p2)   ;;  %vm313_vm1 = vcmask (!%p140_p2), 97280  }
   0x7   : > { %273 = vmatpush1.bf16.msra.mxu0 (!%p140_p2), %v407_v0  ;;  %v413_v8 = vld [vmem:[%s499_s1 + $0x30] sm:$0xff] (!%p140_p2)   ;;  %v414_v9 = vld [vmem:[%s499_s1 + $0x38] sm:$0xff] (!%p140_p2)   ;;  %v415_v10 = vld [vmem:[%s499_s1 + $0x40] sm:$0xff] (!%p140_p2)  }
   0x8   : > { %274 = vmatprep.subr.bf16.mxu0 (!%p140_p2), %v427_v1  ;;  %v382_v12 = vld [vmem:[%s500_s2] ss:$0 sm:$0xff] (!%p140_p2) }
   0xb   : > { %275 = vmatpush1.bf16.msra.mxu0 (!%p140_p2), %v408_v2 }
   0xc   : > { %276 = vmatprep.subr.bf16.mxu0 (!%p140_p2), %v427_v1 }
   0xd   : > { %s503_s16 = smov (!%p165_p3, %s377_s16), 3 }
   0xe   : > { %s397_s21 = sshll.u32 %s503_s16, 3 }
   0xf   : > { %s169_s24 = scalar_lea.vmem %s498_s0, %s397_s21  ;;  %277 = vmatpush1.bf16.msra.mxu0 %v409_v3  ;;  %s175_s15 = scalar_lea.vmem %s501_s3, %s397_s21 }
  0x10   : > { %v418_v5 = vld [vmem:[%s169_s24 + $0x4] ss:$8 sps:$4 sm:$0xff]   ;;  %278 = vmatprep.subr.bf16.mxu0 %v427_v1  ;;  %v416_v11 = vld [vmem:[%s169_s24] ss:$8 sps:$4 sm:$0xff]  }
  0x11   : > { %394 = vmatprep.mubr.msk.bf16.mxu0 %vm268_vm0, %v418_v5 }
  0x13   : > { %279 = vmatpush1.bf16.msra.mxu0 %v410_v4 }
  0x14   : > { %280 = vmatprep.subr.bf16.mxu0 %v427_v1 }
  0x17   : > { %281 = vmatpush1.bf16.msra.mxu0 %v411_v6 }
  0x18   : > { %282 = vmatprep.subr.bf16.mxu0 %v427_v1 }
  0x1b   : > { %283 = vmatpush1.bf16.msra.mxu0 %v412_v7 }
  0x1c   : > { %284 = vmatprep.subr.bf16.mxu0 %v427_v1 }
  0x1f   : > { %285 = vmatpush1.bf16.msra.mxu0 %v413_v8 }
  0x20   : > { %286 = vmatprep.subr.bf16.mxu0 %v427_v1 }
  0x23   : > { %287 = vmatpush1.bf16.msra.mxu0 %v414_v9 }
  0x24   : > { %288 = vmatprep.subr.bf16.mxu0 %v427_v1 }
  0x27   : > { %289 = vmatpush1.bf16.msra.mxu0 %v415_v10 }
  0x2a   : > { %305 = vmatmul.mubr.bf16.vlgmr.msra.gmra.mrb[0].mxu0 %v416_v11 }
  0xfd   : > { %v306_v13 = vpop.f32.mrb[0].mxu0 }
  0xfe   : > { %v307_v14 = vadd.f32 %v382_v12, %v306_v13  ;;  %v308_v15 = vpop.f32.mrb[1].mxu0 }
  0xff   : > { %v309_v16 = vpop.f32.mrb[2].mxu0 }
 0x100   : > { %314 = vst.msk [vmem:[%s175_s15] sm:$0xff] %vm313_vm1, %v307_v14  ;;  %v310_v17 = vadd.f32 %v382_v12, %v309_v16  ;;  %v311_v18 = vpop.f32.mrb[3].mxu0 }
 0x102   : > { %315 = vst.msk [vmem:[%s175_s15 + $0x8] sm:$0xff] %vm313_vm1, %v310_v17 }
 0x103 PF: > { %s13_s12 = sadd.s32 1, %s425_s12  }
 0x104   : > { %p10_p4 = scmp.ge.s32.totalorder %s13_s12, 4  }
 0x106   :  { %12 = sbr.rel (!%p10_p4) target bundleno = 1 (0x1), region = 62 }

</bundles_post_ra>
